<compile_context>
chip_gen: v7x
topology: tpu7x:2x2x1
jax: 0.10.0
libtpu: 0.0.40
codegen_flags: <defaults>
</compile_context>

<pallas_src>
import functools

import jax
import jax.numpy as jnp
import numpy as np
from jax.experimental import pallas as pl
from jax.experimental.pallas import tpu as pltpu

# ---------------------------------------------------------------------------
# Model hyper-parameters (static)
# ---------------------------------------------------------------------------
N = 8                # total INN dim
D = 4                # reduction dim (transformed half)
NMD = N - D          # conditioning half (input dim of s/t)
NLAYERS = 2          # number of hidden layers in each FCNet
WIDTH = 32           # hidden width of each FCNet (fused MLP width = 2*WIDTH)
BATCH = 512          # example batch size
DEFAULT_BLOCK_M = 2048   # batch-tile cap (lane axis of every block)
SLAB_COLS = 128          # packed weight slab lane width (one full lane tile)


# ---------------------------------------------------------------------------
# Pallas kernel (batch-as-lanes)
# ---------------------------------------------------------------------------
def _nvp_up_kernel(xy_ref, w_ref, out_ref, *, d, nmd, width, nlayers, offs):
    """xy_ref: (N, bm) tile; w_ref: (ROWS, 128) fused weight slab;
    out_ref: (d, bm) transformed half only."""
    w2 = 2 * width

    def fused_layer(h, row_off, out_rows, in_dim):
        # Static, 8-aligned slices of the resident slab (no runtime indexing).
        w_t = w_ref[row_off:row_off + out_rows, :in_dim]             # (out, in)
        b = w_ref[row_off:row_off + out_rows, in_dim:in_dim + 1]     # (out, 1)
        z = jnp.dot(w_t, h, preferred_element_type=jnp.float32) + b  # (out, bm)
        # sigmoid via a single EUP transcendental (tanh) instead of exp + div.
        return 0.5 * (jnp.tanh(0.5 * z) + 1.0)

    xy = xy_ref[...]                   # (N, bm), lane axis = batch
    x = xy[:d, :]                      # (d, bm)    transformed half
    y = xy[d:, :]                      # (nmd, bm)  conditioning half

    # Fused input layer: [s_w0 ; t_w0]^T  -> (2*width, nmd)
    h = fused_layer(y, offs["w0"], w2, nmd)
    # Fused hidden layers: block_diag(s_wh, t_wh)^T -> (2*width, 2*width)
    for i in range(nlayers):
        h = fused_layer(h, offs["wh"][i], w2, w2)
    # Fused output layer: (2*d, 2*width) -- rows [0,d) = s head, [d,2d) = t head.
    st = fused_layer(h, offs["wf"], 2 * d, w2)       # (2d, bm), no junk columns

    s_out = st[:d, :]
    t_out = st[d:, :]

    # Single lane-dense full-block store; y passthrough handled in the wrapper.
    out_ref[...] = (x * jnp.exp(s_out) + t_out).astype(out_ref.dtype)


# ---------------------------------------------------------------------------
# Wrapper
# ---------------------------------------------------------------------------
def nvp_up_forward(xy, packed_w, offs, *, block_m=None):
    """xy: (B, N) float32.  packed_w: (ROWS, 128) fused weight slab."""
    B, n = xy.shape
    assert n == N

    cap = block_m if block_m is not None else DEFAULT_BLOCK_M
    bm = min(cap, B)
    if bm != B:
        # Lane-dense tiles: batch (lane) axis of each block must be a multiple
        # of 128 and divide B.  TODO(synk): remainder-tile path for ragged B.
        assert bm % 128 == 0 and B % bm == 0, "batch must tile into lane-aligned blocks"

    rows, cols = packed_w.shape
    kernel = functools.partial(
        _nvp_up_kernel, d=D, nmd=NMD, width=WIDTH, nlayers=NLAYERS, offs=offs
    )

    xy_t = xy.T                                   # (N, B) batch-as-lanes
    grid = (B // bm,)

    xnew_t = pl.pallas_call(
        kernel,
        out_shape=jax.ShapeDtypeStruct((D, B), jnp.float32),
        grid=grid,
        in_specs=[
            pl.BlockSpec((N, bm), lambda i: (0, i)),        # input tile (lane-dense)
            pl.BlockSpec((rows, cols), lambda i: (0, 0)),   # resident weight slab
        ],
        out_specs=pl.BlockSpec((D, bm), lambda i: (0, i)),  # transformed half only
        compiler_params=pltpu.CompilerParams(
            dimension_semantics=("parallel",),   # shards across v7x's 2 TCs when grid > 1
        ),
    )(xy_t, packed_w)

    # y is a pure passthrough: assemble from the caller's xy (never written by
    # the kernel), and transpose the transformed half back to row-major.
    return jnp.concatenate([xnew_t.T, xy[:, D:]], axis=1)


# ---------------------------------------------------------------------------
# Deterministic parameter init (synthetic; mirrors _FCNet shapes for UP:
# indim = N-D, outdim = D).  Weights are (in, out) for the reference.
# ---------------------------------------------------------------------------
def init_params(key):
    def fcnet_params(k):
        ks = jax.random.split(k, 6)
        scale = 0.5
        return {
            "w0": scale * jax.random.normal(ks[0], (NMD, WIDTH), jnp.float32),
            "b0": scale * jax.random.normal(ks[1], (1, WIDTH), jnp.float32),
            "wh": scale * jax.random.normal(ks[2], (NLAYERS, WIDTH, WIDTH), jnp.float32),
            "bh": scale * jax.random.normal(ks[3], (NLAYERS, 1, WIDTH), jnp.float32),
            "wf": scale * jax.random.normal(ks[4], (WIDTH, D), jnp.float32),
            "bf": scale * jax.random.normal(ks[5], (1, D), jnp.float32),
        }

    ks, kt = jax.random.split(key)
    params = {}
    for name, p in (("s", fcnet_params(ks)), ("t", fcnet_params(kt))):
        for k, v in p.items():
            params[f"{name}_{k}"] = v
    return params


# ---------------------------------------------------------------------------
# Fuse s/t into one block-diagonal MLP (transposed, (out, in)) and pack into a
# single lane-dense weight slab.  Each segment stores [W^T | b] in 8-row-aligned
# rows of a (ROWS, 128) f32 array; offsets are static Python ints.
# ---------------------------------------------------------------------------
def _block_diag2(a, b):
    ra, ca = a.shape
    rb, cb = b.shape
    out = jnp.zeros((ra + rb, ca + cb), a.dtype)
    out = out.at[:ra, :ca].set(a)
    out = out.at[ra:, ca:].set(b)
    return out


def pack_params(params):
    segments = []
    offs = {}
    row = 0

    def add(w_t, b):
        # w_t: (out_dim, in_dim) transposed fused weight; b: (out_dim,) bias.
        nonlocal row
        out_dim, in_dim = w_t.shape
        assert in_dim + 1 <= SLAB_COLS
        nrows = ((out_dim + 7) // 8) * 8              # 8-row aligned segment
        seg = jnp.zeros((nrows, SLAB_COLS), jnp.float32)
        seg = seg.at[:out_dim, :in_dim].set(w_t.astype(jnp.float32))
        seg = seg.at[:out_dim, in_dim].set(jnp.reshape(b, (out_dim,)).astype(jnp.float32))
        segments.append(seg)
        off = row
        row += nrows
        return off

    # input layer: W0^T = [s_w0^T ; t_w0^T] -> (2*WIDTH, NMD)
    w0_t = jnp.concatenate([params["s_w0"].T, params["t_w0"].T], axis=0)
    b0 = jnp.concatenate([params["s_b0"], params["t_b0"]], axis=1).reshape(-1)
    offs["w0"] = add(w0_t, b0)

    # hidden layers: block_diag(s_wh, t_wh)^T = block_diag(s_wh^T, t_wh^T)
    offs["wh"] = []
    for i in range(NLAYERS):
        wh_t = _block_diag2(params["s_wh"][i].T, params["t_wh"][i].T)
        bh = jnp.concatenate([params["s_bh"][i], params["t_bh"][i]], axis=1).reshape(-1)
        offs["wh"].append(add(wh_t, bh))

    # output layer: (2*D, 2*WIDTH); rows [0,D) = s head, [D,2D) = t head
    wf_t = _block_diag2(params["s_wf"].T, params["t_wf"].T)
    bf = jnp.concatenate([params["s_bf"], params["t_bf"]], axis=1).reshape(-1)
    offs["wf"] = add(wf_t, bf)

    packed = jnp.concatenate(segments, axis=0)
    return packed, offs


# ---------------------------------------------------------------------------
# Pure-JAX reference for correctness checking (UP coupling, unfused weights)
# ---------------------------------------------------------------------------
def reference_forward(xy, params):
    x = xy[:, :D]
    y = xy[:, D:]

    def mlp(prefix):
        h = jax.nn.sigmoid(y @ params[f"{prefix}_w0"] + params[f"{prefix}_b0"])
        for i in range(NLAYERS):
            h = jax.nn.sigmoid(h @ params[f"{prefix}_wh"][i] + params[f"{prefix}_bh"][i])
        return jax.nn.sigmoid(h @ params[f"{prefix}_wf"] + params[f"{prefix}_bf"])

    return jnp.concatenate([x * jnp.exp(mlp("s")) + mlp("t"), y], axis=1)


# ---------------------------------------------------------------------------
if __name__ == "__main__":
    key = jax.random.PRNGKey(0)
    k_in, k_param = jax.random.split(key)

    xy = jax.random.normal(k_in, (BATCH, N), jnp.float32)
    params = init_params(k_param)
    packed_w, offs = pack_params(params)

    fwd = jax.jit(lambda a, w: nvp_up_forward(a, w, offs))
    out = jax.block_until_ready(fwd(xy, packed_w))

    ref = reference_forward(xy, params)
    np.testing.assert_allclose(np.asarray(out), np.asarray(ref), rtol=1e-5, atol=5e-5)

    print("KERNEL_OK")
</pallas_src>

<mosaic_0001>
module attributes {stable_mosaic.version = 11 : i64} {
  func.func @_nvp_up_kernel(%arg0: i32, %arg1: memref<8x512xf32, #tpu.memory_space<vmem>>, %arg2: memref<200x128xf32, #tpu.memory_space<vmem>>, %arg3: memref<4x512xf32, #tpu.memory_space<vmem>>) attributes {dimension_semantics = [#tpu.dimension_semantics<parallel>], iteration_bounds = array<i64: 1>, scalar_prefetch = 0 : i64, scratch_operands = 0 : i64, tpu.core_type = #tpu.core_type<tc>, window_params = [{transform_indices = @transform_0, window_bounds = array<i64: 8, 512>}, {pipeline_mode = #tpu.pipeline_mode<synchronous>, transform_indices = @transform_1, window_bounds = array<i64: 200, 128>}, {transform_indices = @transform_2, window_bounds = array<i64: 4, 512>}]} {
    %c0 = arith.constant 0 : index
    %c0_0 = arith.constant 0 : index
    %0 = vector.load %arg1[%c0, %c0_0] : memref<8x512xf32, #tpu.memory_space<vmem>>, vector<8x512xf32>
    %1 = vector.extract_strided_slice %0 {offsets = [0, 0], sizes = [4, 512], strides = [1, 1]} : vector<8x512xf32> to vector<4x512xf32>
    %2 = vector.extract_strided_slice %0 {offsets = [4, 0], sizes = [4, 512], strides = [1, 1]} : vector<8x512xf32> to vector<4x512xf32>
    %c0_1 = arith.constant 0 : index
    %c0_2 = arith.constant 0 : index
    %3 = vector.load %arg2[%c0_1, %c0_2] : memref<200x128xf32, #tpu.memory_space<vmem>>, vector<64x4xf32>
    %c0_3 = arith.constant 0 : index
    %c4 = arith.constant 4 : index
    %4 = vector.load %arg2[%c0_3, %c4] : memref<200x128xf32, #tpu.memory_space<vmem>>, vector<64x1xf32>
    %cst = arith.constant dense<0.000000e+00> : vector<64x512xf32>
    %5 = tpu.matmul %3, %2, %cst {dimension_numbers = #tpu.dot_dimension_numbers<[1], [0], [0], [1], [0, 0, 1, 1], [], []>} : vector<64x4xf32>, vector<4x512xf32>, vector<64x512xf32> -> vector<64x512xf32>
    %6 = vector.broadcast %4 : vector<64x1xf32> to vector<64x512xf32>
    %7 = arith.addf %5, %6 : vector<64x512xf32>
    %cst_4 = arith.constant 5.000000e-01 : f32
    %8 = vector.broadcast %cst_4 : f32 to vector<64x512xf32>
    %9 = arith.mulf %8, %7 : vector<64x512xf32>
    %10 = math.tanh %9 : vector<64x512xf32>
    %cst_5 = arith.constant 1.000000e+00 : f32
    %11 = vector.broadcast %cst_5 : f32 to vector<64x512xf32>
    %12 = arith.addf %10, %11 : vector<64x512xf32>
    %cst_6 = arith.constant 5.000000e-01 : f32
    %13 = vector.broadcast %cst_6 : f32 to vector<64x512xf32>
    %14 = arith.mulf %13, %12 : vector<64x512xf32>
    %c64 = arith.constant 64 : index
    %c0_7 = arith.constant 0 : index
    %15 = vector.load %arg2[%c64, %c0_7] : memref<200x128xf32, #tpu.memory_space<vmem>>, vector<64x64xf32>
    %c64_8 = arith.constant 64 : index
    %c64_9 = arith.constant 64 : index
    %16 = vector.load %arg2[%c64_8, %c64_9] : memref<200x128xf32, #tpu.memory_space<vmem>>, vector<64x1xf32>
    %cst_10 = arith.constant dense<0.000000e+00> : vector<64x512xf32>
    %17 = tpu.matmul %15, %14, %cst_10 {dimension_numbers = #tpu.dot_dimension_numbers<[1], [0], [0], [1], [0, 0, 1, 1], [], []>} : vector<64x64xf32>, vector<64x512xf32>, vector<64x512xf32> -> vector<64x512xf32>
    %18 = vector.broadcast %16 : vector<64x1xf32> to vector<64x512xf32>
    %19 = arith.addf %17, %18 : vector<64x512xf32>
    %cst_11 = arith.constant 5.000000e-01 : f32
    %20 = vector.broadcast %cst_11 : f32 to vector<64x512xf32>
    %21 = arith.mulf %20, %19 : vector<64x512xf32>
    %22 = math.tanh %21 : vector<64x512xf32>
    %cst_12 = arith.constant 1.000000e+00 : f32
    %23 = vector.broadcast %cst_12 : f32 to vector<64x512xf32>
    %24 = arith.addf %22, %23 : vector<64x512xf32>
    %cst_13 = arith.constant 5.000000e-01 : f32
    %25 = vector.broadcast %cst_13 : f32 to vector<64x512xf32>
    %26 = arith.mulf %25, %24 : vector<64x512xf32>
    %c128 = arith.constant 128 : index
    %c0_14 = arith.constant 0 : index
    %27 = vector.load %arg2[%c128, %c0_14] : memref<200x128xf32, #tpu.memory_space<vmem>>, vector<64x64xf32>
    %c128_15 = arith.constant 128 : index
    %c64_16 = arith.constant 64 : index
    %28 = vector.load %arg2[%c128_15, %c64_16] : memref<200x128xf32, #tpu.memory_space<vmem>>, vector<64x1xf32>
    %cst_17 = arith.constant dense<0.000000e+00> : vector<64x512xf32>
    %29 = tpu.matmul %27, %26, %cst_17 {dimension_numbers = #tpu.dot_dimension_numbers<[1], [0], [0], [1], [0, 0, 1, 1], [], []>} : vector<64x64xf32>, vector<64x512xf32>, vector<64x512xf32> -> vector<64x512xf32>
    %30 = vector.broadcast %28 : vector<64x1xf32> to vector<64x512xf32>
    %31 = arith.addf %29, %30 : vector<64x512xf32>
    %cst_18 = arith.constant 5.000000e-01 : f32
    %32 = vector.broadcast %cst_18 : f32 to vector<64x512xf32>
    %33 = arith.mulf %32, %31 : vector<64x512xf32>
    %34 = math.tanh %33 : vector<64x512xf32>
    %cst_19 = arith.constant 1.000000e+00 : f32
    %35 = vector.broadcast %cst_19 : f32 to vector<64x512xf32>
    %36 = arith.addf %34, %35 : vector<64x512xf32>
    %cst_20 = arith.constant 5.000000e-01 : f32
    %37 = vector.broadcast %cst_20 : f32 to vector<64x512xf32>
    %38 = arith.mulf %37, %36 : vector<64x512xf32>
    %c192 = arith.constant 192 : index
    %c0_21 = arith.constant 0 : index
    %39 = vector.load %arg2[%c192, %c0_21] : memref<200x128xf32, #tpu.memory_space<vmem>>, vector<8x64xf32>
    %c192_22 = arith.constant 192 : index
    %c64_23 = arith.constant 64 : index
    %40 = vector.load %arg2[%c192_22, %c64_23] : memref<200x128xf32, #tpu.memory_space<vmem>>, vector<8x1xf32>
    %cst_24 = arith.constant dense<0.000000e+00> : vector<8x512xf32>
    %41 = tpu.matmul %39, %38, %cst_24 {dimension_numbers = #tpu.dot_dimension_numbers<[1], [0], [0], [1], [0, 0, 1, 1], [], []>} : vector<8x64xf32>, vector<64x512xf32>, vector<8x512xf32> -> vector<8x512xf32>
    %42 = vector.broadcast %40 : vector<8x1xf32> to vector<8x512xf32>
    %43 = arith.addf %41, %42 : vector<8x512xf32>
    %cst_25 = arith.constant 5.000000e-01 : f32
    %44 = vector.broadcast %cst_25 : f32 to vector<8x512xf32>
    %45 = arith.mulf %44, %43 : vector<8x512xf32>
    %46 = math.tanh %45 : vector<8x512xf32>
    %cst_26 = arith.constant 1.000000e+00 : f32
    %47 = vector.broadcast %cst_26 : f32 to vector<8x512xf32>
    %48 = arith.addf %46, %47 : vector<8x512xf32>
    %cst_27 = arith.constant 5.000000e-01 : f32
    %49 = vector.broadcast %cst_27 : f32 to vector<8x512xf32>
    %50 = arith.mulf %49, %48 : vector<8x512xf32>
    %51 = vector.extract_strided_slice %50 {offsets = [0, 0], sizes = [4, 512], strides = [1, 1]} : vector<8x512xf32> to vector<4x512xf32>
    %52 = vector.extract_strided_slice %50 {offsets = [4, 0], sizes = [4, 512], strides = [1, 1]} : vector<8x512xf32> to vector<4x512xf32>
    %53 = math.exp %51 : vector<4x512xf32>
    %54 = arith.mulf %1, %53 : vector<4x512xf32>
    %55 = arith.addf %54, %52 : vector<4x512xf32>
    %c0_28 = arith.constant 0 : index
    %c0_29 = arith.constant 0 : index
    %56 = vector.load %arg3[%c0_28, %c0_29] : memref<4x512xf32, #tpu.memory_space<vmem>>, vector<4x512xf32>
    tpu.vector_store %arg3[%c0_28, %c0_29], %55 {strides = array<i32>} : memref<4x512xf32, #tpu.memory_space<vmem>>, vector<4x512xf32>,
    return
  }
  func.func @transform_0(%arg0: i32) -> (i32, i32) {
    %c0_i32 = arith.constant 0 : i32
    %c0_i32_0 = arith.constant 0 : i32
    return %c0_i32, %arg0 : i32, i32
  }
  func.func @transform_1(%arg0: i32) -> (i32, i32) {
    %c0_i32 = arith.constant 0 : i32
    %c0_i32_0 = arith.constant 0 : i32
    %c0_i32_1 = arith.constant 0 : i32
    return %c0_i32, %c0_i32_0 : i32, i32
  }
  func.func @transform_2(%arg0: i32) -> (i32, i32) {
    %c0_i32 = arith.constant 0 : i32
    %c0_i32_0 = arith.constant 0 : i32
    return %c0_i32, %arg0 : i32, i32
  }
}

</mosaic_0001>

<bundles_post_ra>
// kernel: _lambda_.1
= control target key start
LH: loop header
LB: loop body
LE: loop exit
PB: predicated region body
PF: predicated region fallthrough
CT: control target
= control target key end

     0   :  { %7 = vsyncpa [#allocation3], 0  ;;  %s2255_s0 = inlined_call_operand.hbm [shape: f32[8,512], index: 0, kind: input, shape index: {}]   ;;  %s2256_s1 = inlined_call_operand.hbm [shape: f32[200,128], index: 1, kind: input, shape index: {}]   ;;  %s2257_s2 = inlined_call_operand.vmem [shape: f32[4,512], index: 2, kind: output, shape index: {}]  }
   0x1   :  { %8 = vsyncpa [#allocation5], 0  ;;  %s1954_s9 = smov [#allocation2]   ;;  %s1955_s11 = smov [#allocation4]  }
   0x2   :  { %s15_s10 = sshll.u32 %s1954_s9, 4  ;;  %s24_s12 = sshll.u32 %s1955_s11, 4  ;;  %s16_s10 = int_to_ptr.vmem [resolvable:$true] %s15_s10  ;;  %s1976_s12 = int_to_ptr.vmem [resolvable:$true] %s24_s12 }
   0x3   :  { %s1906_s15 = scalar_lea.hbm %s2255_s0, 512 }
   0x4   :  { %p1907_p0 = scmp.ne.s32.totalorder %s2255_s0, %s1906_s15  ;;  %p1910_p1 = scmp.lt.u32.totalorder %s1906_s15, %s2255_s0 }
   0x6   :  { %p1912_p2 = pnand %p1910_p1, %p1907_p0 }
   0x8   :  { %1915 = shalt.err (!%p1912_p2)
}
   0x9   :  { %s1916_s20 = scalar_lea.vmem %s16_s10, 512  ;;  %p1921_p4 = scmp.lt.s32.totalorder %s16_s10, %s16_s10 }
   0xa   :  { %p1917_p3 = scmp.ne.s32.totalorder %s16_s10, %s1916_s20  ;;  %p1922_p5 = scmp.lt.s32.totalorder %s1916_s20, %s1916_s20 }
   0xc   :  { %p1923_p6 = por %p1922_p5, %p1921_p4 }
   0xe   :  { %p1924_p7 = pnand %p1923_p6, %p1917_p3 }
  0x10   :  { %1927 = shalt.err (!%p1924_p7)
}
  0x11   :  { %18 = dma.hbm_to_vmem [thread:$0]  %s2255_s0, 512, %s16_s10, [#allocation3]  }
  0x12   :  { %s1928_s25 = scalar_lea.hbm %s2256_s1, 3200 }
  0x13   :  { %p1929_p8 = scmp.ne.s32.totalorder %s2256_s1, %s1928_s25  ;;  %p1932_p9 = scmp.lt.u32.totalorder %s1928_s25, %s2256_s1 }
  0x15   :  { %p1934_p10 = pnand %p1932_p9, %p1929_p8 }
  0x17   :  { %1937 = shalt.err (!%p1934_p10)
}
  0x18   :  { %s1938_s30 = scalar_lea.vmem %s1976_s12, 3200  ;;  %p1943_p12 = scmp.lt.s32.totalorder %s1976_s12, %s1976_s12 }
  0x19   :  { %p1939_p11 = scmp.ne.s32.totalorder %s1976_s12, %s1938_s30  ;;  %p1944_p13 = scmp.lt.s32.totalorder %s1938_s30, %s1938_s30 }
  0x1b   :  { %p1945_p0 = por %p1944_p13, %p1943_p12 }
  0x1d   :  { %p1946_p1 = pnand %p1945_p0, %p1939_p11 }
  0x1f   :  { %1949 = shalt.err (!%p1946_p1)
}
  0x20   :  { %s1956_s0 = smov 128   ;;  %s1957_s3 = smov 8  }
  0x21   :  { %30 = dma.hbm_to_vmem [thread:$0]  %s2256_s1, 3200, %s1976_s12, [#allocation5], %s1956_s0, %s1956_s0, %s1957_s3  }
  0x22   :  { %1950 = dma.done.wait [#allocation3], 512  }
  0x23   :  { %1951 = vsyncadd [#allocation3], 4294966784 }
  0x24   :  { %1952 = dma.done.wait [#allocation5], 3200  }
  0x25   :  { %1953 = vsyncadd [#allocation5], 4294964096  ;;  %v1958_v0 = vmov 0.0   ;;  %v1959_v1 = vmov 4   ;;  %v38_v2 = vld [vmem:[#allocation2 + $0x8] sm:$0xff]  ;;  %vm114_vm0 = vcmask 1043456  }
  0x26   :  { %187 = vmatprep.mubr.f32.mxu0 %v1958_v0  ;;  %300 = vmatprep.mubr.f32.mxu1 %v1958_v0  ;;  %v40_v3 = vld [vmem:[#allocation2 + $0x18] sm:$0xff]  ;;  %v37_v4 = vld [vmem:[#allocation2] sm:$0xff]  ;;  %v94_v5 = vrot.slane %v38_v2, 4  ;;  %v39_v8 = vld [vmem:[#allocation2 + $0x10] sm:$0xff]  ;;  %vm97_vm1 = vcmask 31744   ;;  %v1960_v20 = vmov 64  }
  0x27   :  { %1681 = vset.pattern.permute.xlu0 %v1959_v1  ;;  %1682 = vset.pattern.permute.xlu1 %v1959_v1  ;;  %v96_v6 = vrot.slane %v40_v3, 4  ;;  %v93_v7 = vrot.slane %v37_v4, 4  ;;  %v41_v9 = vld [vmem:[#allocation4] sm:$0xff]  ;;  %v95_v10 = vrot.slane %v39_v8, 4  ;;  %v42_v11 = vld [vmem:[#allocation4 + $0x8] sm:$0xff]  ;;  %v43_v12 = vld [vmem:[#allocation4 + $0x10] sm:$0xff] }
  0x28   :  { %51 = vperm.xlu0 %1681, %v41_v9   ;;  %1524 = vmatprep.subr.msk.mxu0 %vm114_vm0, %v94_v5  ;;  %v44_v13 = vld [vmem:[#allocation4 + $0x18] sm:$0xff]  ;;  %v45_v14 = vld [vmem:[#allocation4 + $0x20] sm:$0xff]  ;;  %v46_v15 = vld [vmem:[#allocation4 + $0x28] sm:$0xff]  ;;  %vm525_vm2 = vcmask 523264  }
  0x29   :  { %1534 = vmatprep.subr.msk.mxu1 %vm114_vm0, %v96_v6  ;;  %1525 = vmatpush1.msk.msra.mxu0 %vm114_vm0, %v93_v7  ;;  %v47_v16 = vld [vmem:[#allocation4 + $0x30] sm:$0xff]  ;;  %v48_v17 = vld [vmem:[#allocation4 + $0x38] sm:$0xff]  ;;  %v2041_v18 = vld [vmem:[#allocation4 + $0x40] sm:$0xff] }
  0x2a   :  { %1535 = vmatpush1.msk.msra.mxu1 %vm114_vm0, %v95_v10  ;;  %1526 = vmatmul.mubr.msk.f32.vlgmr.msra.gmra.mrb[0].mxu0 %vm97_vm1, %v41_v9  ;;  %v2043_v19 = vld [vmem:[#allocation4 + $0x48] sm:$0xff]  ;;  %v2047_v21 = vld [vmem:[#allocation4 + $0x50] sm:$0xff]  ;;  %v2049_v22 = vld [vmem:[#allocation4 + $0x58] sm:$0xff] }
  0x2b   :  { %1536 = vmatmul.mubr.msk.f32.vlgmr.msra.gmra.mrb[0].mxu1 %vm97_vm1, %v41_v9  ;;  %193 = vmatprep.mubr.f32.mxu0 %v1958_v0  ;;  %v2053_v23 = vld [vmem:[#allocation4 + $0x60] sm:$0xff]  ;;  %v2055_v24 = vld [vmem:[#allocation4 + $0x68] sm:$0xff]  ;;  %v2059_v25 = vld [vmem:[#allocation4 + $0x70] sm:$0xff] }
  0x2c   :  { %306 = vmatprep.mubr.f32.mxu1 %v1958_v0  ;;  %56 = vperm.xlu0 %1681, %v42_v11   ;;  %v2061_v26 = vld [vmem:[#allocation4 + $0x78] sm:$0xff]  ;;  %v896_v27 = vld [vmem:[#allocation4 + $0x80] sm:$0xff]  ;;  %v897_v28 = vld [vmem:[#allocation4 + $0x88] sm:$0xff] }
  0x2d   :  { %61 = vperm.xlu1 %1682, %v43_v12   ;;  %v898_v29 = vld [vmem:[#allocation4 + $0x90] sm:$0xff]  ;;  %v899_v30 = vld [vmem:[#allocation4 + $0x98] sm:$0xff]  ;;  %v900_v31 = vld [vmem:[#allocation4 + $0xa0] sm:$0xff] }
  0x2e   :  { %1527 = vmatmul.mubr.msk.f32.gmra.mrb[2].mxu0 %vm97_vm1, %v42_v11  ;;  %v901_v32 = vld [vmem:[#allocation4 + $0xa8] sm:$0xff]  ;;  %v902_v33 = vld [vmem:[#allocation4 + $0xb0] sm:$0xff]  ;;  %v903_v34 = vld [vmem:[#allocation4 + $0xb8] sm:$0xff] }
  0x2f   :  { %1537 = vmatmul.mubr.msk.f32.gmra.mrb[2].mxu1 %vm97_vm1, %v42_v11  ;;  %199 = vmatprep.mubr.f32.mxu0 %v1958_v0  ;;  %v1314_v36 = vld [vmem:[#allocation4 + $0xc0] sm:$0xff] }
  0x30   :  { %312 = vmatprep.mubr.f32.mxu1 %v1958_v0  ;;  %71 = vperm.xlu0 %1681, %v45_v14  }
  0x31   :  { %66 = vperm.xlu1 %1682, %v44_v13  }
  0x32   :  { %1528 = vmatmul.mubr.msk.f32.gmra.mrb[4].mxu0 %vm97_vm1, %v43_v12 }
  0x33   :  { %1538 = vmatmul.mubr.msk.f32.gmra.mrb[4].mxu1 %vm97_vm1, %v43_v12  ;;  %205 = vmatprep.mubr.f32.mxu0 %v1958_v0 }
  0x34   :  { %318 = vmatprep.mubr.f32.mxu1 %v1958_v0  ;;  %81 = vperm.xlu0 %1681, %v47_v16  }
  0x35   :  { %76 = vperm.xlu1 %1682, %v46_v15  }
  0x36   :  { %1529 = vmatmul.mubr.msk.f32.gmra.mrb[6].mxu0 %vm97_vm1, %v44_v13 }
  0x37   :  { %1539 = vmatmul.mubr.msk.f32.gmra.mrb[6].mxu1 %vm97_vm1, %v44_v13  ;;  %211 = vmatprep.mubr.f32.mxu0 %v1958_v0 }
  0x38   :  { %324 = vmatprep.mubr.f32.mxu1 %v1958_v0  ;;  %1683 = vset.pattern.permute.xlu0 %v1960_v20 }
  0x39   :  { %86 = vperm.xlu1 %1682, %v48_v17   ;;  %487 = vperm.xlu0 %1683, %v2041_v18  }
  0x3a   :  { %1530 = vmatmul.mubr.msk.f32.gmra.mrb[8].mxu0 %vm97_vm1, %v45_v14 }
  0x3b   :  { %1540 = vmatmul.mubr.msk.f32.gmra.mrb[8].mxu1 %vm97_vm1, %v45_v14  ;;  %217 = vmatprep.mubr.f32.mxu0 %v1958_v0 }
  0x3c   :  { %330 = vmatprep.mubr.f32.mxu1 %v1958_v0 }
  0x3d   :  { %1684 = vset.pattern.permute.xlu1 %v1960_v20  ;;  %502 = vperm.xlu0 %1683, %v2049_v22  }
  0x3e   :  { %1531 = vmatmul.mubr.msk.f32.gmra.mrb[10].mxu0 %vm97_vm1, %v46_v15  ;;  %492 = vperm.xlu1 %1684, %v2043_v19  }
  0x3f   :  { %1541 = vmatmul.mubr.msk.f32.gmra.mrb[10].mxu1 %vm97_vm1, %v46_v15  ;;  %223 = vmatprep.mubr.f32.mxu0 %v1958_v0 }
  0x40   :  { %336 = vmatprep.mubr.f32.mxu1 %v1958_v0 }
  0x41   :  { %512 = vperm.xlu0 %1683, %v2055_v24  }
  0x42   :  { %1532 = vmatmul.mubr.msk.f32.gmra.mrb[12].mxu0 %vm97_vm1, %v47_v16  ;;  %497 = vperm.xlu1 %1684, %v2047_v21  }
  0x43   :  { %1542 = vmatmul.mubr.msk.f32.gmra.mrb[12].mxu1 %vm97_vm1, %v47_v16  ;;  %229 = vmatprep.mubr.f32.mxu0 %v1958_v0 }
  0x44   :  { %342 = vmatprep.mubr.f32.mxu1 %v1958_v0 }
  0x45   :  { %522 = vperm.xlu0 %1683, %v2061_v26  }
  0x46   :  { %1533 = vmatmul.mubr.msk.f32.gmra.mrb[14].mxu0 %vm97_vm1, %v48_v17  ;;  %507 = vperm.xlu1 %1684, %v2053_v23  }
  0x47   :  { %1543 = vmatmul.mubr.msk.f32.gmra.mrb[14].mxu1 %vm97_vm1, %v48_v17  ;;  %606 = vmatprep.mubr.f32.mxu0 %v1958_v0 }
  0x48   :  { %719 = vmatprep.mubr.f32.mxu1 %v1958_v0 }
  0x49   :  { %911 = vperm.xlu0 %1683, %v897_v28  }
  0x4a   :  { %517 = vperm.xlu1 %1684, %v2059_v25  }
  0x4d   :  { %921 = vperm.xlu0 %1683, %v899_v30  }
  0x4e   :  { %906 = vperm.xlu1 %1684, %v896_v27  }
  0x51   :  { %931 = vperm.xlu0 %1683, %v901_v32  }
  0x52   :  { %916 = vperm.xlu1 %1684, %v898_v29  }
  0x55   :  { %941 = vperm.xlu0 %1683, %v903_v34  }
  0x56   :  { %926 = vperm.xlu1 %1684, %v900_v31  }
  0x5a   :  { %936 = vperm.xlu1 %1684, %v902_v33  }
  0x5e   :  { %1317 = vperm.xlu1 %1684, %v1314_v36  }
  0xa7   :  { %v52_v35 = vpop.permute.xlu0 %51 }
  0xab   :  { %v57_v43 = vpop.permute.xlu0 %56 }
  0xac   :  { %v62_v46 = vpop.permute.xlu1 %61 }
  0xaf   :  { %v72_v30 = vpop.permute.xlu0 %71 }
  0xb0   :  { %v67_v8 = vpop.permute.xlu1 %66 }
  0xfd   :  { %v189_v37 = vpop.f32.mrb[0].mxu0 }
  0xfe   :  { %v302_v38 = vpop.f32.mrb[0].mxu1  ;;  %v190_v39 = vadd.f32 %v189_v37, %v52_v35  ;;  %v191_v41 = vpop.f32.mrb[1].mxu0 }
  0xff   :  { %v303_v40 = vadd.f32 %v302_v38, %v52_v35  ;;  %v304_v42 = vpop.f32.mrb[1].mxu1  ;;  %v192_v44 = vadd.f32 %v191_v41, %v52_v35 }
 0x100   :  { %v305_v45 = vadd.f32 %v304_v42, %v52_v35  ;;  %v349_v47 = vmul.f32 0.5, %v190_v39 }
 0x101   :  { %v351_v48 = vmul.f32 0.5, %v303_v40  ;;  %v350_v49 = vmul.f32 0.5, %v192_v44  ;;  %v195_v51 = vpop.f32.mrb[2].mxu0 }
 0x102   :  { %v352_v50 = vmul.f32 0.5, %v305_v45  ;;  %v308_v52 = vpop.f32.mrb[2].mxu1  ;;  %1685 = vtanh.f32 %v349_v47  ;;  %v196_v53 = vadd.f32 %v195_v51, %v57_v43  ;;  %v197_v55 = vpop.f32.mrb[3].mxu0 }
 0x103   :  { %v309_v54 = vadd.f32 %v308_v52, %v57_v43  ;;  %v310_v56 = vpop.f32.mrb[3].mxu1  ;;  %1687 = vtanh.f32 %v351_v48  ;;  %v198_v57 = vadd.f32 %v197_v55, %v57_v43 }
 0x104   :  { %v311_v58 = vadd.f32 %v310_v56, %v57_v43  ;;  %1689 = vtanh.f32 %v350_v49  ;;  %v353_v59 = vmul.f32 0.5, %v196_v53 }
 0x105   :  { %v355_v60 = vmul.f32 0.5, %v309_v54  ;;  %1691 = vtanh.f32 %v352_v50  ;;  %v354_v61 = vmul.f32 0.5, %v198_v57  ;;  %v201_v63 = vpop.f32.mrb[4].mxu0 }
 0x106   :  { %v356_v62 = vmul.f32 0.5, %v311_v58  ;;  %v314_v1 = vpop.f32.mrb[4].mxu1  ;;  %1693 = vtanh.f32 %v353_v59  ;;  %v202_v2 = vadd.f32 %v201_v63, %v62_v46  ;;  %v203_v4 = vpop.f32.mrb[5].mxu0 }
 0x107   :  { %v315_v3 = vadd.f32 %v314_v1, %v62_v46  ;;  %v316_v5 = vpop.f32.mrb[5].mxu1  ;;  %1695 = vtanh.f32 %v355_v60  ;;  %v204_v6 = vadd.f32 %v203_v4, %v62_v46  ;;  %v77_v63 = vpop.permute.xlu1 %76 }
 0x108   :  { %v317_v7 = vadd.f32 %v316_v5, %v62_v46  ;;  %1697 = vtanh.f32 %v354_v61  ;;  %v357_v9 = vmul.f32 0.5, %v202_v2 }
 0x109   :  { %v359_v10 = vmul.f32 0.5, %v315_v3  ;;  %1699 = vtanh.f32 %v356_v62  ;;  %v358_v11 = vmul.f32 0.5, %v204_v6  ;;  %v207_v13 = vpop.f32.mrb[6].mxu0 }
 0x10a   :  { %v360_v12 = vmul.f32 0.5, %v317_v7  ;;  %v320_v14 = vpop.f32.mrb[6].mxu1  ;;  %1701 = vtanh.f32 %v357_v9  ;;  %v208_v15 = vadd.f32 %v207_v13, %v67_v8  ;;  %v209_v17 = vpop.f32.mrb[7].mxu0 }
 0x10b   :  { %v321_v16 = vadd.f32 %v320_v14, %v67_v8  ;;  %v322_v20 = vpop.f32.mrb[7].mxu1  ;;  %1703 = vtanh.f32 %v359_v10  ;;  %v210_v27 = vadd.f32 %v209_v17, %v67_v8 }
 0x10c   :  { %v323_v28 = vadd.f32 %v322_v20, %v67_v8  ;;  %v1686_v29 = vpop.eup %1685  ;;  %1705 = vtanh.f32 %v358_v11  ;;  %v361_v31 = vmul.f32 0.5, %v208_v15 }
 0x10d   :  { %v363_v32 = vmul.f32 0.5, %v321_v16  ;;  %v1688_v33 = vpop.eup %1687  ;;  %v413_v34 = vadd.f32 1.0, %v1686_v29  ;;  %1707 = vtanh.f32 %v360_v12  ;;  %v362_v35 = vmul.f32 0.5, %v210_v27  ;;  %v213_v37 = vpop.f32.mrb[8].mxu0 }
 0x10e   :  { %v364_v36 = vmul.f32 0.5, %v323_v28  ;;  %v326_v38 = vpop.f32.mrb[8].mxu1  ;;  %v1690_v39 = vpop.eup %1689  ;;  %1709 = vtanh.f32 %v361_v31  ;;  %v214_v40 = vadd.f32 %v213_v37, %v72_v30  ;;  %v415_v47 = vadd.f32 1.0, %v1688_v33 }
 0x10f   :  { %v327_v41 = vadd.f32 %v326_v38, %v72_v30  ;;  %v215_v42 = vpop.f32.mrb[9].mxu0  ;;  %v328_v43 = vpop.f32.mrb[9].mxu1  ;;  %1711 = vtanh.f32 %v363_v32  ;;  %v2065_v50 = vmul.f32 0.5, %v413_v34  ;;  %v414_v56 = vadd.f32 1.0, %v1690_v39 }
 0x110   :  { %v1692_v44 = vpop.eup %1691  ;;  %v216_v45 = vadd.f32 %v215_v42, %v72_v30  ;;  %1713 = vtanh.f32 %v362_v35  ;;  %v365_v48 = vmul.f32 0.5, %v214_v40  ;;  %v329_v2 = vadd.f32 %v328_v43, %v72_v30  ;;  %v82_v35 = vpop.permute.xlu0 %81 }
 0x111   :  { %v1694_v46 = vpop.eup %1693  ;;  %1715 = vtanh.f32 %v364_v36  ;;  %v367_v52 = vmul.f32 0.5, %v327_v41  ;;  %v219_v53 = vpop.f32.mrb[10].mxu0  ;;  %v2069_v4 = vmul.f32 0.5, %v415_v47  ;;  %v416_v9 = vadd.f32 1.0, %v1692_v44 }
 0x112   :  { %v1696_v49 = vpop.eup %1695  ;;  %v417_v51 = vadd.f32 1.0, %v1694_v46  ;;  %v332_v54 = vpop.f32.mrb[10].mxu1  ;;  %1717 = vtanh.f32 %v365_v48  ;;  %v366_v58 = vmul.f32 0.5, %v216_v45  ;;  %v220_v7 = vadd.f32 %v219_v53, %v77_v63 }
 0x113   :  { %v1698_v55 = vpop.eup %1697  ;;  %v419_v57 = vadd.f32 1.0, %v1696_v49  ;;  %v221_v59 = vpop.f32.mrb[11].mxu0  ;;  %1719 = vtanh.f32 %v367_v52  ;;  %v368_v12 = vmul.f32 0.5, %v329_v2  ;;  %v2075_v16 = vmul.f32 0.5, %v414_v56 }
 0x114   :  { %v334_v60 = vpop.f32.mrb[11].mxu1  ;;  %v1700_v61 = vpop.eup %1699  ;;  %v2067_v62 = vmul.f32 0.5, %v417_v51  ;;  %v418_v1 = vadd.f32 1.0, %v1698_v55  ;;  %1721 = vtanh.f32 %v366_v58  ;;  %v369_v20 = vmul.f32 0.5, %v220_v7 }
 0x115   :  { %v1702_v3 = vpop.eup %1701  ;;  %v2071_v5 = vmul.f32 0.5, %v419_v57  ;;  %v420_v6 = vadd.f32 1.0, %v1700_v61  ;;  %v225_v13 = vpop.f32.mrb[12].mxu0  ;;  %v333_v33 = vadd.f32 %v332_v54, %v77_v63  ;;  %v222_v38 = vadd.f32 %v221_v59, %v77_v63 }
 0x116   :  { %v1704_v8 = vpop.eup %1703  ;;  %v1580_v10 = vpack.c.bf16 %v2067_v62, %v2065_v50  ;;  %v421_v11 = vadd.f32 1.0, %v1702_v3  ;;  %v338_v14 = vpop.f32.mrb[12].mxu1  ;;  %v450_v30 = vmul.f32 0.5, %v418_v1  ;;  %1723 = vtanh.f32 %v369_v20 }
 0x117   :  { %v1706_v15 = vpop.eup %1705  ;;  %v1596_v17 = vpack.c.bf16 %v2071_v5, %v2069_v4  ;;  %v227_v27 = vpop.f32.mrb[13].mxu0  ;;  %v452_v31 = vmul.f32 0.5, %v420_v6  ;;  %v423_v32 = vadd.f32 1.0, %v1704_v8  ;;  %1725 = vtanh.f32 %v368_v12 }
 0x118   :  { %v340_v28 = vpop.f32.mrb[13].mxu1  ;;  %v1708_v29 = vpop.eup %1707  ;;  %v2079_v36 = vmul.f32 0.5, %v421_v11  ;;  %v422_v37 = vadd.f32 1.0, %v1706_v15  ;;  %v371_v41 = vmul.f32 0.5, %v333_v33  ;;  %v335_v42 = vadd.f32 %v334_v60, %v77_v63 }
 0x119   :  { %v1710_v34 = vpop.eup %1709  ;;  %v231_v43 = vpop.f32.mrb[14].mxu0  ;;  %v424_v46 = vadd.f32 1.0, %v1708_v29  ;;  %v370_v48 = vmul.f32 0.5, %v222_v38  ;;  %v226_v49 = vadd.f32 %v225_v13, %v82_v35  ;;  %v2083_v58 = vmul.f32 0.5, %v423_v32 }
 0x11a   :  { %v1712_v39 = vpop.eup %1711  ;;  %v425_v40 = vadd.f32 1.0, %v1710_v34  ;;  %v344_v44 = vpop.f32.mrb[14].mxu1  ;;  %1727 = vtanh.f32 %v371_v41  ;;  %v372_v56 = vmul.f32 0.5, %v335_v42  ;;  %v448_v63 = vmul.f32 0.5, %v416_v9 }
 0x11b   :  { %v1714_v45 = vpop.eup %1713  ;;  %v427_v47 = vadd.f32 1.0, %v1712_v39  ;;  %v233_v51 = vpop.f32.mrb[15].mxu0  ;;  %1729 = vtanh.f32 %v370_v48  ;;  %v373_v2 = vmul.f32 0.5, %v226_v49  ;;  %v454_v3 = vmul.f32 0.5, %v422_v37 }
 0x11c   :  { %v346_v52 = vpop.f32.mrb[15].mxu1  ;;  %v1716_v53 = vpop.eup %1715  ;;  %v2081_v54 = vmul.f32 0.5, %v425_v40  ;;  %v426_v55 = vadd.f32 1.0, %v1714_v45  ;;  %1731 = vtanh.f32 %v372_v56  ;;  %v456_v6 = vmul.f32 0.5, %v424_v46 }
 0x11d   :  { %v1718_v57 = vpop.eup %1717  ;;  %v2085_v59 = vmul.f32 0.5, %v427_v47  ;;  %v428_v60 = vadd.f32 1.0, %v1716_v53  ;;  %v339_v13 = vadd.f32 %v338_v14, %v82_v35  ;;  %v228_v15 = vadd.f32 %v227_v27, %v82_v35  ;;  %v87_v29 = vpop.permute.xlu1 %86 }
 0x11e   :  { %v1720_v61 = vpop.eup %1719  ;;  %v1584_v1 = vpack.c.bf16 %v2081_v54, %v2079_v36  ;;  %v429_v8 = vadd.f32 1.0, %v1718_v57  ;;  %v458_v11 = vmul.f32 0.5, %v426_v55  ;;  %v341_v33 = vadd.f32 %v340_v28, %v82_v35 }
 0x11f   :  { %v1600_v7 = vpack.c.bf16 %v2085_v59, %v2083_v58  ;;  %v460_v12 = vmul.f32 0.5, %v428_v60  ;;  %v1722_v20 = vpop.eup %1721  ;;  %v431_v32 = vadd.f32 1.0, %v1720_v61  ;;  %v1578_v9 = vpack.c.bf16 %v450_v30, %v2075_v16 }
 0x120   :  { %v1594_v34 = vpack.c.bf16 %v452_v31, %v448_v63  ;;  %1733 = vtanh.f32 %v373_v2  ;;  %v375_v36 = vmul.f32 0.5, %v339_v13  ;;  %v374_v38 = vmul.f32 0.5, %v228_v15  ;;  %v1724_v39 = vpop.eup %1723 }
 0x121   :  { %v232_v37 = vadd.f32 %v231_v43, %v87_v29  ;;  %v461_v40 = vmul.f32 0.5, %v429_v8  ;;  %v376_v41 = vmul.f32 0.5, %v341_v33  ;;  %1579 = vmatprep.subr.bf16.mxu0 %v1578_v9  ;;  %v345_v42 = vadd.f32 %v344_v44, %v87_v29  ;;  %v1726_v14 = vpop.eup %1725 }
 0x122   :  { %1595 = vmatprep.subr.bf16.mxu1 %v1594_v34  ;;  %v234_v45 = vadd.f32 %v233_v51, %v87_v29  ;;  %v433_v27 = vadd.f32 1.0, %v1724_v39  ;;  %1735 = vtanh.f32 %v375_v36  ;;  %1581 = vmatpush1.bf16.msra.mxu0 %v1580_v10  ;;  %v347_v16 = vadd.f32 %v346_v52, %v87_v29 }
 0x123   :  { %v377_v46 = vmul.f32 0.5, %v232_v37  ;;  %1597 = vmatpush1.bf16.msra.mxu1 %v1596_v17  ;;  %v430_v28 = vadd.f32 1.0, %v1722_v20  ;;  %1737 = vtanh.f32 %v374_v38  ;;  %v379_v30 = vmul.f32 0.5, %v345_v42 }
 0x124   :  { %v378_v31 = vmul.f32 0.5, %v234_v45  ;;  %v1728_v35 = vpop.eup %1727  ;;  %v465_v43 = vmul.f32 0.5, %v433_v27  ;;  %1739 = vtanh.f32 %v376_v41  ;;  %v380_v44 = vmul.f32 0.5, %v347_v16 }
 0x125   :  { %v1582_v47 = vpack.c.bf16 %v458_v11, %v454_v3  ;;  %v1730_v48 = vpop.eup %1729  ;;  %v432_v49 = vadd.f32 1.0, %v1726_v14  ;;  %v435_v51 = vadd.f32 1.0, %v1728_v35  ;;  %1741 = vtanh.f32 %v377_v46 }
 0x126   :  { %v1598_v50 = vpack.c.bf16 %v460_v12, %v456_v6  ;;  %v1732_v62 = vpop.eup %1731  ;;  %v1588_v10 = vpack.c.bf16 %v465_v43, %v461_v40  ;;  %v434_v53 = vadd.f32 1.0, %v1730_v48  ;;  %1743 = vtanh.f32 %v379_v30 }
 0x127   :  { %1583 = vmatprep.subr.bf16.mxu0 %v1582_v47  ;;  %v463_v4 = vmul.f32 0.5, %v431_v32  ;;  %v467_v5 = vmul.f32 0.5, %v435_v51  ;;  %v436_v17 = vadd.f32 1.0, %v1732_v62  ;;  %1745 = vtanh.f32 %v378_v31 }
 0x128   :  { %1599 = vmatprep.subr.bf16.mxu1 %v1598_v50  ;;  %1585 = vmatpush1.bf16.msra.mxu0 %v1584_v1  ;;  %v462_v52 = vmul.f32 0.5, %v430_v28  ;;  %v466_v54 = vmul.f32 0.5, %v434_v53  ;;  %1747 = vtanh.f32 %v380_v44  ;;  %v464_v55 = vmul.f32 0.5, %v432_v49 }
 0x129   :  { %1601 = vmatpush1.bf16.msra.mxu1 %v1600_v7  ;;  %v1604_v56 = vpack.c.bf16 %v467_v5, %v463_v4  ;;  %v468_v57 = vmul.f32 0.5, %v436_v17 }
 0x12a   :  { %v1734_v58 = vpop.eup %1733  ;;  %v1586_v59 = vpack.c.bf16 %v466_v54, %v462_v52 }
 0x12b   :  { %v1602_v60 = vpack.c.bf16 %v468_v57, %v464_v55  ;;  %v437_v3 = vadd.f32 1.0, %v1734_v58 }
 0x12c   :  { %v1736_v61 = vpop.eup %1735  ;;  %1587 = vmatprep.subr.bf16.mxu0 %v1586_v59 }
 0x12d   :  { %v1738_v63 = vpop.eup %1737  ;;  %1603 = vmatprep.subr.bf16.mxu1 %v1602_v60  ;;  %1589 = vmatpush1.bf16.msra.mxu0 %v1588_v10  ;;  %v439_v1 = vadd.f32 1.0, %v1736_v61  ;;  %v469_v29 = vmul.f32 0.5, %v437_v3 }
 0x12e   :  { %v1740_v2 = vpop.eup %1739  ;;  %1605 = vmatpush1.bf16.msra.mxu1 %v1604_v56  ;;  %v438_v11 = vadd.f32 1.0, %v1738_v63 }
 0x12f   :  { %v1742_v6 = vpop.eup %1741  ;;  %v440_v13 = vadd.f32 1.0, %v1740_v2  ;;  %v471_v9 = vmul.f32 0.5, %v439_v1 }
 0x130   :  { %v1744_v8 = vpop.eup %1743  ;;  %v441_v12 = vadd.f32 1.0, %v1742_v6  ;;  %v470_v38 = vmul.f32 0.5, %v438_v11 }
 0x131   :  { %v1746_v7 = vpop.eup %1745  ;;  %v443_v15 = vadd.f32 1.0, %v1744_v8  ;;  %v472_v40 = vmul.f32 0.5, %v440_v13 }
 0x132   :  { %v1748_v20 = vpop.eup %1747  ;;  %v473_v32 = vmul.f32 0.5, %v441_v12  ;;  %v442_v33 = vadd.f32 1.0, %v1746_v7 }
 0x133   :  { %v475_v34 = vmul.f32 0.5, %v443_v15  ;;  %v444_v36 = vadd.f32 1.0, %v1748_v20 }
 0x134   :  { %v1592_v37 = vpack.c.bf16 %v473_v32, %v469_v29  ;;  %v474_v39 = vmul.f32 0.5, %v442_v33 }
 0x135   :  { %v1608_v41 = vpack.c.bf16 %v475_v34, %v471_v9  ;;  %v476_v42 = vmul.f32 0.5, %v444_v36 }
 0x136   :  { %v1590_v45 = vpack.c.bf16 %v474_v39, %v470_v38 }
 0x137   :  { %v1606_v14 = vpack.c.bf16 %v476_v42, %v472_v40 }
 0x138   :  { %1591 = vmatprep.subr.bf16.mxu0 %v1590_v45 }
 0x139   :  { %1607 = vmatprep.subr.bf16.mxu1 %v1606_v14  ;;  %1593 = vmatpush1.bf16.msra.mxu0 %v1592_v37 }
 0x13a   :  { %1609 = vmatpush1.bf16.msra.mxu1 %v1608_v41 }
 0x13c   :  { %1544 = vmatmul.mubr.msk.f32.vlgmr.msra.gmra.mrb[16].mxu0 %vm525_vm2, %v2041_v18 }
 0x13d   :  { %1552 = vmatmul.mubr.msk.f32.vlgmr.msra.gmra.mrb[16].mxu1 %vm525_vm2, %v2041_v18  ;;  %612 = vmatprep.mubr.f32.mxu0 %v1958_v0  ;;  %v488_v18 = vpop.permute.xlu0 %487 }
 0x13e   :  { %725 = vmatprep.mubr.f32.mxu1 %v1958_v0 }
 0x140   :  { %1545 = vmatmul.mubr.msk.f32.gmra.mrb[18].mxu0 %vm525_vm2, %v2043_v19 }
 0x141   :  { %1553 = vmatmul.mubr.msk.f32.gmra.mrb[18].mxu1 %vm525_vm2, %v2043_v19  ;;  %618 = vmatprep.mubr.f32.mxu0 %v1958_v0  ;;  %v503_v61 = vpop.permute.xlu0 %502 }
 0x142   :  { %731 = vmatprep.mubr.f32.mxu1 %v1958_v0 }
 0x144   :  { %1546 = vmatmul.mubr.msk.f32.gmra.mrb[20].mxu0 %vm525_vm2, %v2047_v21 }
 0x145   :  { %1554 = vmatmul.mubr.msk.f32.gmra.mrb[20].mxu1 %vm525_vm2, %v2047_v21  ;;  %624 = vmatprep.mubr.f32.mxu0 %v1958_v0 }
 0x146   :  { %737 = vmatprep.mubr.f32.mxu1 %v1958_v0 }
 0x148   :  { %1547 = vmatmul.mubr.msk.f32.gmra.mrb[22].mxu0 %vm525_vm2, %v2049_v22 }
 0x149   :  { %1555 = vmatmul.mubr.msk.f32.gmra.mrb[22].mxu1 %vm525_vm2, %v2049_v22  ;;  %630 = vmatprep.mubr.f32.mxu0 %v1958_v0 }
 0x14a   :  { %743 = vmatprep.mubr.f32.mxu1 %v1958_v0 }
 0x14c   :  { %1548 = vmatmul.mubr.msk.f32.gmra.mrb[24].mxu0 %vm525_vm2, %v2053_v23 }
 0x14d   :  { %1556 = vmatmul.mubr.msk.f32.gmra.mrb[24].mxu1 %vm525_vm2, %v2053_v23  ;;  %636 = vmatprep.mubr.f32.mxu0 %v1958_v0 }
 0x14e   :  { %749 = vmatprep.mubr.f32.mxu1 %v1958_v0 }
 0x150   :  { %1549 = vmatmul.mubr.msk.f32.gmra.mrb[26].mxu0 %vm525_vm2, %v2055_v24 }
 0x151   :  { %1557 = vmatmul.mubr.msk.f32.gmra.mrb[26].mxu1 %vm525_vm2, %v2055_v24  ;;  %642 = vmatprep.mubr.f32.mxu0 %v1958_v0  ;;  %v493_v24 = vpop.permute.xlu1 %492 }
 0x152   :  { %755 = vmatprep.mubr.f32.mxu1 %v1958_v0 }
 0x154   :  { %1550 = vmatmul.mubr.msk.f32.gmra.mrb[28].mxu0 %vm525_vm2, %v2059_v25 }
 0x155   :  { %1558 = vmatmul.mubr.msk.f32.gmra.mrb[28].mxu1 %vm525_vm2, %v2059_v25  ;;  %648 = vmatprep.mubr.f32.mxu0 %v1958_v0  ;;  %v498_v10 = vpop.permute.xlu1 %497 }
 0x156   :  { %761 = vmatprep.mubr.f32.mxu1 %v1958_v0 }
 0x158   :  { %1551 = vmatmul.mubr.msk.f32.gmra.mrb[30].mxu0 %vm525_vm2, %v2061_v26 }
 0x159   :  { %1559 = vmatmul.mubr.msk.f32.gmra.mrb[30].mxu1 %vm525_vm2, %v2061_v26  ;;  %1024 = vmatprep.mubr.f32.mxu0 %v1958_v0  ;;  %v508_v33 = vpop.permute.xlu1 %507 }
 0x15a   :  { %1137 = vmatprep.mubr.f32.mxu1 %v1958_v0 }
 0x20f   :  { %v608_v19 = vpop.f32.mrb[16].mxu0 }
 0x210   :  { %v609_v21 = vadd.f32 %v608_v19, %v488_v18  ;;  %v721_v22 = vpop.f32.mrb[16].mxu1  ;;  %v610_v23 = vpop.f32.mrb[17].mxu0 }
 0x211   :  { %v722_v25 = vadd.f32 %v721_v22, %v488_v18  ;;  %v611_v27 = vadd.f32 %v610_v23, %v488_v18  ;;  %v723_v46 = vpop.f32.mrb[17].mxu1 }
 0x212   :  { %v768_v16 = vmul.f32 0.5, %v609_v21  ;;  %v724_v28 = vadd.f32 %v723_v46, %v488_v18 }
 0x213   :  { %v770_v30 = vmul.f32 0.5, %v722_v25  ;;  %v769_v31 = vmul.f32 0.5, %v611_v27  ;;  %v614_v35 = vpop.f32.mrb[18].mxu0 }
 0x214   :  { %1749 = vtanh.f32 %v768_v16  ;;  %v771_v26 = vmul.f32 0.5, %v724_v28  ;;  %v615_v43 = vadd.f32 %v614_v35, %v493_v24  ;;  %v727_v44 = vpop.f32.mrb[18].mxu1  ;;  %v616_v47 = vpop.f32.mrb[19].mxu0 }
 0x215   :  { %1751 = vtanh.f32 %v770_v30  ;;  %v728_v48 = vadd.f32 %v727_v44, %v493_v24  ;;  %v617_v49 = vadd.f32 %v616_v47, %v493_v24  ;;  %v729_v51 = vpop.f32.mrb[19].mxu1  ;;  %v513_v47 = vpop.permute.xlu0 %512 }
 0x216   :  { %1753 = vtanh.f32 %v769_v31  ;;  %v772_v50 = vmul.f32 0.5, %v615_v43  ;;  %v730_v62 = vadd.f32 %v729_v51, %v493_v24 }
 0x217   :  { %1755 = vtanh.f32 %v771_v26  ;;  %v774_v53 = vmul.f32 0.5, %v728_v48  ;;  %v773_v4 = vmul.f32 0.5, %v617_v49  ;;  %v620_v5 = vpop.f32.mrb[20].mxu0 }
 0x218   :  { %1757 = vtanh.f32 %v772_v50  ;;  %v775_v17 = vmul.f32 0.5, %v730_v62  ;;  %v621_v52 = vadd.f32 %v620_v5, %v498_v10  ;;  %v733_v54 = vpop.f32.mrb[20].mxu1  ;;  %v622_v55 = vpop.f32.mrb[21].mxu0 }
 0x219   :  { %1759 = vtanh.f32 %v774_v53  ;;  %v734_v56 = vadd.f32 %v733_v54, %v498_v10  ;;  %v623_v57 = vadd.f32 %v622_v55, %v498_v10  ;;  %v735_v58 = vpop.f32.mrb[21].mxu1 }
 0x21a   :  { %1761 = vtanh.f32 %v773_v4  ;;  %v776_v59 = vmul.f32 0.5, %v621_v52  ;;  %v736_v60 = vadd.f32 %v735_v58, %v498_v10 }
 0x21b   :  { %1763 = vtanh.f32 %v775_v17  ;;  %v778_v63 = vmul.f32 0.5, %v734_v56  ;;  %v777_v2 = vmul.f32 0.5, %v623_v57  ;;  %v626_v3 = vpop.f32.mrb[22].mxu0 }
 0x21c   :  { %1765 = vtanh.f32 %v776_v59  ;;  %v779_v6 = vmul.f32 0.5, %v736_v60  ;;  %v627_v1 = vadd.f32 %v626_v3, %v503_v61  ;;  %v739_v8 = vpop.f32.mrb[22].mxu1  ;;  %v628_v11 = vpop.f32.mrb[23].mxu0 }
 0x21d   :  { %1767 = vtanh.f32 %v778_v63  ;;  %v740_v12 = vadd.f32 %v739_v8, %v503_v61  ;;  %v629_v7 = vadd.f32 %v628_v11, %v503_v61  ;;  %v741_v13 = vpop.f32.mrb[23].mxu1 }
 0x21e   :  { %v1750_v15 = vpop.eup %1749  ;;  %1769 = vtanh.f32 %v777_v2  ;;  %v780_v20 = vmul.f32 0.5, %v627_v1  ;;  %v742_v29 = vadd.f32 %v741_v13, %v503_v61 }
 0x21f   :  { %v1752_v32 = vpop.eup %1751  ;;  %v832_v9 = vadd.f32 1.0, %v1750_v15  ;;  %1771 = vtanh.f32 %v779_v6  ;;  %v782_v34 = vmul.f32 0.5, %v740_v12  ;;  %v781_v36 = vmul.f32 0.5, %v629_v7  ;;  %v632_v38 = vpop.f32.mrb[24].mxu0 }
 0x220   :  { %v1754_v37 = vpop.eup %1753  ;;  %v834_v39 = vadd.f32 1.0, %v1752_v32  ;;  %1773 = vtanh.f32 %v780_v20  ;;  %v783_v40 = vmul.f32 0.5, %v742_v29  ;;  %v633_v41 = vadd.f32 %v632_v38, %v508_v33  ;;  %v745_v42 = vpop.f32.mrb[24].mxu1 }
 0x221   :  { %v634_v45 = vpop.f32.mrb[25].mxu0  ;;  %v1756_v14 = vpop.eup %1755  ;;  %1775 = vtanh.f32 %v782_v34  ;;  %v746_v18 = vadd.f32 %v745_v42, %v508_v33  ;;  %v2146_v24 = vmul.f32 0.5, %v832_v9  ;;  %v833_v25 = vadd.f32 1.0, %v1754_v37 }
 0x222   :  { %v747_v19 = vpop.f32.mrb[25].mxu1  ;;  %v1758_v21 = vpop.eup %1757  ;;  %1777 = vtanh.f32 %v781_v36  ;;  %v784_v22 = vmul.f32 0.5, %v633_v41  ;;  %v2148_v28 = vmul.f32 0.5, %v834_v39  ;;  %v635_v35 = vadd.f32 %v634_v45, %v508_v33 }
 0x223   :  { %v1760_v23 = vpop.eup %1759  ;;  %v836_v27 = vadd.f32 1.0, %v1758_v21  ;;  %1779 = vtanh.f32 %v783_v40  ;;  %v638_v46 = vpop.f32.mrb[26].mxu0  ;;  %v786_v31 = vmul.f32 0.5, %v746_v18  ;;  %v748_v51 = vadd.f32 %v747_v19, %v508_v33 }
 0x224   :  { %v1762_v16 = vpop.eup %1761  ;;  %v838_v30 = vadd.f32 1.0, %v1760_v23  ;;  %v751_v26 = vpop.f32.mrb[26].mxu1  ;;  %1781 = vtanh.f32 %v784_v22  ;;  %v785_v4 = vmul.f32 0.5, %v635_v35  ;;  %v639_v5 = vadd.f32 %v638_v46, %v513_v47 }
 0x225   :  { %v640_v43 = vpop.f32.mrb[27].mxu0  ;;  %v1764_v44 = vpop.eup %1763  ;;  %v2150_v48 = vmul.f32 0.5, %v836_v27  ;;  %v837_v49 = vadd.f32 1.0, %v1762_v16  ;;  %v835_v52 = vadd.f32 1.0, %v1756_v14  ;;  %v2156_v58 = vmul.f32 0.5, %v833_v25 }
 0x226   :  { %v753_v50 = vpop.f32.mrb[27].mxu1  ;;  %v1766_v62 = vpop.eup %1765  ;;  %v2152_v10 = vmul.f32 0.5, %v838_v30  ;;  %v839_v53 = vadd.f32 1.0, %v1764_v44  ;;  %1783 = vtanh.f32 %v786_v31  ;;  %v787_v60 = vmul.f32 0.5, %v748_v51 }
 0x227   :  { %v1768_v17 = vpop.eup %1767  ;;  %v1612_v54 = vpack.c.bf16 %v2150_v48, %v2146_v24  ;;  %v840_v55 = vadd.f32 1.0, %v1766_v62  ;;  %v644_v56 = vpop.f32.mrb[28].mxu0  ;;  %v869_v3 = vmul.f32 0.5, %v837_v49  ;;  %v788_v8 = vmul.f32 0.5, %v639_v5 }
 0x228   :  { %v1770_v57 = vpop.eup %1769  ;;  %v1628_v59 = vpack.c.bf16 %v2152_v10, %v2148_v28  ;;  %v757_v61 = vpop.f32.mrb[28].mxu1  ;;  %v871_v6 = vmul.f32 0.5, %v839_v53  ;;  %v842_v1 = vadd.f32 1.0, %v1768_v17  ;;  %1785 = vtanh.f32 %v785_v4 }
 0x229   :  { %v646_v63 = vpop.f32.mrb[29].mxu0  ;;  %v1772_v2 = vpop.eup %1771  ;;  %v2160_v7 = vmul.f32 0.5, %v840_v55  ;;  %v752_v13 = vadd.f32 %v751_v26, %v513_v47  ;;  %v641_v15 = vadd.f32 %v640_v43, %v513_v47  ;;  %v841_v32 = vadd.f32 1.0, %v1770_v57 }
 0x22a   :  { %v759_v11 = vpop.f32.mrb[29].mxu1  ;;  %v1774_v12 = vpop.eup %1773  ;;  %1787 = vtanh.f32 %v788_v8  ;;  %v754_v9 = vadd.f32 %v753_v50, %v513_v47  ;;  %v843_v45 = vadd.f32 1.0, %v1772_v2  ;;  %v2164_v22 = vmul.f32 0.5, %v842_v1 }
 0x22b   :  { %v1776_v20 = vpop.eup %1775  ;;  %v518_v29 = vpop.permute.xlu1 %517  ;;  %v844_v33 = vadd.f32 1.0, %v1774_v12  ;;  %1789 = vtanh.f32 %v787_v60  ;;  %v790_v37 = vmul.f32 0.5, %v752_v13  ;;  %v789_v39 = vmul.f32 0.5, %v641_v15 }
 0x22c   :  { %v650_v34 = vpop.f32.mrb[30].mxu0  ;;  %v1778_v36 = vpop.eup %1777  ;;  %v846_v38 = vadd.f32 1.0, %v1776_v20  ;;  %v791_v18 = vmul.f32 0.5, %v754_v9  ;;  %v645_v19 = vadd.f32 %v644_v56, %v518_v29  ;;  %v758_v25 = vadd.f32 %v757_v61, %v518_v29 }
 0x22d   :  { %v763_v40 = vpop.f32.mrb[30].mxu1  ;;  %v652_v41 = vpop.f32.mrb[31].mxu0  ;;  %v2162_v14 = vmul.f32 0.5, %v844_v33  ;;  %1791 = vtanh.f32 %v790_v37  ;;  %v867_v46 = vmul.f32 0.5, %v835_v52  ;;  %v845_v30 = vadd.f32 1.0, %v1778_v36 }
 0x22e   :  { %v1780_v42 = vpop.eup %1779  ;;  %v765_v21 = vpop.f32.mrb[31].mxu1  ;;  %v2166_v23 = vmul.f32 0.5, %v846_v38  ;;  %1793 = vtanh.f32 %v789_v39  ;;  %v873_v31 = vmul.f32 0.5, %v841_v32  ;;  %v875_v43 = vmul.f32 0.5, %v843_v45 }
 0x22f   :  { %v1782_v27 = vpop.eup %1781  ;;  %v1616_v16 = vpack.c.bf16 %v2162_v14, %v2160_v7  ;;  %v847_v26 = vadd.f32 1.0, %v1780_v42  ;;  %1795 = vtanh.f32 %v791_v18  ;;  %v792_v44 = vmul.f32 0.5, %v645_v19  ;;  %v523_v50 = vpop.permute.xlu0 %522 }
 0x230   :  { %v1632_v35 = vpack.c.bf16 %v2166_v23, %v2164_v22  ;;  %v794_v47 = vmul.f32 0.5, %v758_v25  ;;  %v647_v49 = vadd.f32 %v646_v63, %v518_v29  ;;  %v1784_v51 = vpop.eup %1783  ;;  %v848_v62 = vadd.f32 1.0, %v1782_v27 }
 0x231   :  { %v760_v53 = vadd.f32 %v759_v11, %v518_v29  ;;  %v1610_v4 = vpack.c.bf16 %v869_v3, %v2156_v58  ;;  %v1626_v5 = vpack.c.bf16 %v871_v6, %v867_v46  ;;  %v877_v17 = vmul.f32 0.5, %v845_v30 }
 0x232   :  { %1797 = vtanh.f32 %v792_v44  ;;  %v793_v52 = vmul.f32 0.5, %v647_v49  ;;  %v651_v55 = vadd.f32 %v650_v34, %v523_v50  ;;  %v1786_v56 = vpop.eup %1785  ;;  %v879_v57 = vmul.f32 0.5, %v847_v26 }
 0x233   :  { %1799 = vtanh.f32 %v794_v47  ;;  %v795_v60 = vmul.f32 0.5, %v760_v53  ;;  %1611 = vmatprep.subr.bf16.mxu0 %v1610_v4  ;;  %1627 = vmatprep.subr.bf16.mxu1 %v1626_v5  ;;  %v764_v61 = vadd.f32 %v763_v40, %v523_v50  ;;  %v850_v63 = vadd.f32 1.0, %v1784_v51 }
 0x234   :  { %v1788_v2 = vpop.eup %1787  ;;  %1801 = vtanh.f32 %v793_v52  ;;  %v796_v1 = vmul.f32 0.5, %v651_v55  ;;  %1613 = vmatpush1.bf16.msra.mxu0 %v1612_v54  ;;  %1629 = vmatpush1.bf16.msra.mxu1 %v1628_v59  ;;  %v653_v58 = vadd.f32 %v652_v41, %v523_v50  ;;  %v880_v6 = vmul.f32 0.5, %v848_v62 }
 0x235   :  { %v1790_v3 = vpop.eup %1789  ;;  %v852_v8 = vadd.f32 1.0, %v1788_v2  ;;  %1803 = vtanh.f32 %v795_v60  ;;  %v798_v11 = vmul.f32 0.5, %v764_v61  ;;  %v766_v7 = vadd.f32 %v765_v21, %v523_v50  ;;  %v1894_v60 = vld [vmem:[#allocation4 + $0x88] sm:$0xff]  ;;  %v1895_v61 = vld [vmem:[#allocation4 + $0x90] sm:$0xff]  ;;  %v1896_v2 = vld [vmem:[#allocation4 + $0x98] sm:$0xff] }
 0x236   :  { %1805 = vtanh.f32 %v796_v1  ;;  %v797_v12 = vmul.f32 0.5, %v653_v58  ;;  %v1614_v13 = vpack.c.bf16 %v877_v17, %v873_v31  ;;  %v849_v20 = vadd.f32 1.0, %v1786_v56  ;;  %v1898_v1 = vld [vmem:[#allocation4 + $0xa8] sm:$0xff]  ;;  %v1899_v58 = vld [vmem:[#allocation4 + $0xb0] sm:$0xff] }
 0x237   :  { %v1792_v15 = vpop.eup %1791  ;;  %v884_v29 = vmul.f32 0.5, %v852_v8  ;;  %1807 = vtanh.f32 %v798_v11  ;;  %v1630_v24 = vpack.c.bf16 %v879_v57, %v875_v43  ;;  %v851_v54 = vadd.f32 1.0, %v1790_v3  ;;  %v1893_v57 = vld [vmem:[#allocation4 + $0x80] sm:$0xff]  ;;  %v1900_v3 = vld [vmem:[#allocation4 + $0xb8] sm:$0xff] }
 0x238   :  { %v1794_v48 = vpop.eup %1793  ;;  %v854_v32 = vadd.f32 1.0, %v1792_v15  ;;  %1809 = vtanh.f32 %v797_v12  ;;  %v799_v28 = vmul.f32 0.5, %v766_v7  ;;  %1615 = vmatprep.subr.bf16.mxu0 %v1614_v13  ;;  %v882_v9 = vmul.f32 0.5, %v850_v63  ;;  %v1897_v63 = vld [vmem:[#allocation4 + $0xa0] sm:$0xff] }
 0x239   :  { %v1796_v10 = vpop.eup %1795  ;;  %v1620_v59 = vpack.c.bf16 %v884_v29, %v880_v6  ;;  %v853_v33 = vadd.f32 1.0, %v1794_v48  ;;  %1631 = vmatprep.subr.bf16.mxu1 %v1630_v24  ;;  %1617 = vmatpush1.bf16.msra.mxu0 %v1616_v16  ;;  %v881_v38 = vmul.f32 0.5, %v849_v20  ;;  %v883_v40 = vmul.f32 0.5, %v851_v54  ;;  %v907_v6 = vpop.permute.xlu1 %906 }
 0x23a   :  { %v886_v34 = vmul.f32 0.5, %v854_v32  ;;  %v855_v36 = vadd.f32 1.0, %v1796_v10  ;;  %1811 = vtanh.f32 %v799_v28  ;;  %1633 = vmatpush1.bf16.msra.mxu1 %v1632_v35  ;;  %v912_v24 = vpop.permute.xlu0 %911 }
 0x23b   :  { %v885_v37 = vmul.f32 0.5, %v853_v33 }
 0x23c   :  { %v1798_v39 = vpop.eup %1797  ;;  %v1636_v41 = vpack.c.bf16 %v886_v34, %v882_v9  ;;  %v887_v42 = vmul.f32 0.5, %v855_v36 }
 0x23d   :  { %v1800_v45 = vpop.eup %1799  ;;  %v1618_v14 = vpack.c.bf16 %v885_v37, %v881_v38  ;;  %v856_v22 = vadd.f32 1.0, %v1798_v39  ;;  %v917_v37 = vpop.permute.xlu1 %916 }
 0x23e   :  { %v1802_v18 = vpop.eup %1801  ;;  %v1634_v19 = vpack.c.bf16 %v887_v42, %v883_v40  ;;  %v858_v25 = vadd.f32 1.0, %v1800_v45 }
 0x23f   :  { %v1804_v21 = vpop.eup %1803  ;;  %1619 = vmatprep.subr.bf16.mxu0 %v1618_v14  ;;  %v857_v46 = vadd.f32 1.0, %v1802_v18  ;;  %v888_v35 = vmul.f32 0.5, %v856_v22 }
 0x240   :  { %v1806_v23 = vpop.eup %1805  ;;  %1635 = vmatprep.subr.bf16.mxu1 %v1634_v19  ;;  %1621 = vmatpush1.bf16.msra.mxu0 %v1620_v59  ;;  %v859_v26 = vadd.f32 1.0, %v1804_v21  ;;  %v890_v49 = vmul.f32 0.5, %v858_v25 }
 0x241   :  { %v1808_v27 = vpop.eup %1807  ;;  %v860_v16 = vadd.f32 1.0, %v1806_v23  ;;  %1637 = vmatpush1.bf16.msra.mxu1 %v1636_v41  ;;  %v889_v50 = vmul.f32 0.5, %v857_v46 }
 0x242   :  { %v1810_v30 = vpop.eup %1809  ;;  %v862_v31 = vadd.f32 1.0, %v1808_v27  ;;  %v891_v17 = vmul.f32 0.5, %v859_v26  ;;  %v922_v27 = vpop.permute.xlu0 %921 }
 0x243   :  { %v892_v43 = vmul.f32 0.5, %v860_v16  ;;  %v861_v44 = vadd.f32 1.0, %v1810_v30 }
 0x244   :  { %v1812_v47 = vpop.eup %1811  ;;  %v894_v51 = vmul.f32 0.5, %v862_v31 }
 0x245   :  { %v1624_v62 = vpack.c.bf16 %v892_v43, %v888_v35  ;;  %v893_v53 = vmul.f32 0.5, %v861_v44  ;;  %v863_v4 = vadd.f32 1.0, %v1812_v47 }
 0x246   :  { %v1640_v5 = vpack.c.bf16 %v894_v51, %v890_v49 }
 0x247   :  { %v895_v52 = vmul.f32 0.5, %v863_v4  ;;  %v1622_v55 = vpack.c.bf16 %v893_v53, %v889_v50  ;;  %v927_v4 = vpop.permute.xlu1 %926 }
 0x249   :  { %1623 = vmatprep.subr.bf16.mxu0 %v1622_v55  ;;  %v1638_v56 = vpack.c.bf16 %v895_v52, %v891_v17 }
 0x24a   :  { %1625 = vmatpush1.bf16.msra.mxu0 %v1624_v62 }
 0x24b   :  { %1639 = vmatprep.subr.bf16.mxu1 %v1638_v56 }
 0x24c   :  { %1641 = vmatpush1.bf16.msra.mxu1 %v1640_v5 }
 0x24d   :  { %1560 = vmatmul.mubr.msk.f32.vlgmr.msra.gmra.mrb[32].mxu0 %vm525_vm2, %v1893_v57 }
 0x24e   :  { %1030 = vmatprep.mubr.f32.mxu0 %v1958_v0 }
 0x24f   :  { %1568 = vmatmul.mubr.msk.f32.vlgmr.msra.gmra.mrb[32].mxu1 %vm525_vm2, %v1893_v57 }
 0x250   :  { %1143 = vmatprep.mubr.f32.mxu1 %v1958_v0 }
 0x251   :  { %1561 = vmatmul.mubr.msk.f32.gmra.mrb[34].mxu0 %vm525_vm2, %v1894_v60 }
 0x252   :  { %1036 = vmatprep.mubr.f32.mxu0 %v1958_v0 }
 0x253   :  { %1569 = vmatmul.mubr.msk.f32.gmra.mrb[34].mxu1 %vm525_vm2, %v1894_v60 }
 0x254   :  { %1149 = vmatprep.mubr.f32.mxu1 %v1958_v0 }
 0x255   :  { %1562 = vmatmul.mubr.msk.f32.gmra.mrb[36].mxu0 %vm525_vm2, %v1895_v61 }
 0x256   :  { %1042 = vmatprep.mubr.f32.mxu0 %v1958_v0 }
 0x257   :  { %1570 = vmatmul.mubr.msk.f32.gmra.mrb[36].mxu1 %vm525_vm2, %v1895_v61 }
 0x258   :  { %1155 = vmatprep.mubr.f32.mxu1 %v1958_v0 }
 0x259   :  { %1563 = vmatmul.mubr.msk.f32.gmra.mrb[38].mxu0 %vm525_vm2, %v1896_v2 }
 0x25a   :  { %1048 = vmatprep.mubr.f32.mxu0 %v1958_v0 }
 0x25b   :  { %1571 = vmatmul.mubr.msk.f32.gmra.mrb[38].mxu1 %vm525_vm2, %v1896_v2 }
 0x25c   :  { %1161 = vmatprep.mubr.f32.mxu1 %v1958_v0 }
 0x25d   :  { %1564 = vmatmul.mubr.msk.f32.gmra.mrb[40].mxu0 %vm525_vm2, %v1897_v63 }
 0x25e   :  { %1054 = vmatprep.mubr.f32.mxu0 %v1958_v0 }
 0x25f   :  { %1572 = vmatmul.mubr.msk.f32.gmra.mrb[40].mxu1 %vm525_vm2, %v1897_v63 }
 0x260   :  { %1167 = vmatprep.mubr.f32.mxu1 %v1958_v0 }
 0x261   :  { %1565 = vmatmul.mubr.msk.f32.gmra.mrb[42].mxu0 %vm525_vm2, %v1898_v1 }
 0x262   :  { %1060 = vmatprep.mubr.f32.mxu0 %v1958_v0 }
 0x263   :  { %1573 = vmatmul.mubr.msk.f32.gmra.mrb[42].mxu1 %vm525_vm2, %v1898_v1 }
 0x264   :  { %1173 = vmatprep.mubr.f32.mxu1 %v1958_v0 }
 0x265   :  { %1566 = vmatmul.mubr.msk.f32.gmra.mrb[44].mxu0 %vm525_vm2, %v1899_v58 }
 0x266   :  { %1066 = vmatprep.mubr.f32.mxu0 %v1958_v0 }
 0x267   :  { %1574 = vmatmul.mubr.msk.f32.gmra.mrb[44].mxu1 %vm525_vm2, %v1899_v58 }
 0x268   :  { %1179 = vmatprep.mubr.f32.mxu1 %v1958_v0 }
 0x269   :  { %1567 = vmatmul.mubr.msk.f32.gmra.mrb[46].mxu0 %vm525_vm2, %v1900_v3 }
 0x26a   :  { %1386 = vmatprep.mubr.f32.mxu0 %v1958_v0 }
 0x26b   :  { %1575 = vmatmul.mubr.msk.f32.gmra.mrb[46].mxu1 %vm525_vm2, %v1900_v3 }
 0x26c   :  { %1457 = vmatprep.mubr.f32.mxu1 %v1958_v0 }
 0x320   :  { %v1026_v8 = vpop.f32.mrb[32].mxu0 }
 0x321   :  { %v1027_v11 = vadd.f32 %v1026_v8, %v907_v6  ;;  %v1028_v12 = vpop.f32.mrb[33].mxu0 }
 0x322   :  { %v1139_v7 = vpop.f32.mrb[32].mxu1  ;;  %v1029_v13 = vadd.f32 %v1028_v12, %v907_v6 }
 0x323   :  { %v1186_v15 = vmul.f32 0.5, %v1027_v11  ;;  %v1140_v20 = vadd.f32 %v1139_v7, %v907_v6  ;;  %v1141_v29 = vpop.f32.mrb[33].mxu1 }
 0x324   :  { %v1187_v48 = vmul.f32 0.5, %v1029_v13  ;;  %v1142_v54 = vadd.f32 %v1141_v29, %v907_v6  ;;  %v1032_v32 = vpop.f32.mrb[34].mxu0 }
 0x325   :  { %1813 = vtanh.f32 %v1186_v15  ;;  %v1188_v28 = vmul.f32 0.5, %v1140_v20  ;;  %v1033_v10 = vadd.f32 %v1032_v32, %v912_v24  ;;  %v1034_v59 = vpop.f32.mrb[35].mxu0 }
 0x326   :  { %1815 = vtanh.f32 %v1187_v48  ;;  %v1189_v33 = vmul.f32 0.5, %v1142_v54  ;;  %v1145_v0 = vpop.f32.mrb[34].mxu1  ;;  %v1035_v9 = vadd.f32 %v1034_v59, %v912_v24 }
 0x327   :  { %1817 = vtanh.f32 %v1188_v28  ;;  %v1190_v34 = vmul.f32 0.5, %v1033_v10  ;;  %v1146_v36 = vadd.f32 %v1145_v0, %v912_v24  ;;  %v1147_v38 = vpop.f32.mrb[35].mxu1  ;;  %v932_v10 = vpop.permute.xlu0 %931 }
 0x328   :  { %1819 = vtanh.f32 %v1189_v33  ;;  %v1191_v39 = vmul.f32 0.5, %v1035_v9  ;;  %v1148_v40 = vadd.f32 %v1147_v38, %v912_v24  ;;  %v1038_v41 = vpop.f32.mrb[36].mxu0 }
 0x329   :  { %1821 = vtanh.f32 %v1190_v34  ;;  %v1192_v42 = vmul.f32 0.5, %v1146_v36  ;;  %v1039_v45 = vadd.f32 %v1038_v41, %v917_v37  ;;  %v1040_v14 = vpop.f32.mrb[37].mxu0 }
 0x32a   :  { %1823 = vtanh.f32 %v1191_v39  ;;  %v1193_v18 = vmul.f32 0.5, %v1148_v40  ;;  %v1151_v19 = vpop.f32.mrb[36].mxu1  ;;  %v1041_v21 = vadd.f32 %v1040_v14, %v917_v37 }
 0x32b   :  { %1825 = vtanh.f32 %v1192_v42  ;;  %v1194_v22 = vmul.f32 0.5, %v1039_v45  ;;  %v1152_v23 = vadd.f32 %v1151_v19, %v917_v37  ;;  %v1153_v25 = vpop.f32.mrb[37].mxu1 }
 0x32c   :  { %1827 = vtanh.f32 %v1193_v18  ;;  %v1195_v46 = vmul.f32 0.5, %v1041_v21  ;;  %v1154_v16 = vadd.f32 %v1153_v25, %v917_v37  ;;  %v1044_v30 = vpop.f32.mrb[38].mxu0 }
 0x32d   :  { %1829 = vtanh.f32 %v1194_v22  ;;  %v1196_v31 = vmul.f32 0.5, %v1152_v23  ;;  %v1045_v35 = vadd.f32 %v1044_v30, %v922_v27  ;;  %v1046_v26 = vpop.f32.mrb[39].mxu0 }
 0x32e   :  { %1831 = vtanh.f32 %v1195_v46  ;;  %v1197_v43 = vmul.f32 0.5, %v1154_v16  ;;  %v1157_v44 = vpop.f32.mrb[38].mxu1  ;;  %v1047_v47 = vadd.f32 %v1046_v26, %v922_v27 }
 0x32f   :  { %v1814_v49 = vpop.eup %1813  ;;  %1833 = vtanh.f32 %v1196_v31  ;;  %v1198_v51 = vmul.f32 0.5, %v1045_v35  ;;  %v1158_v50 = vadd.f32 %v1157_v44, %v922_v27  ;;  %v1159_v62 = vpop.f32.mrb[39].mxu1 }
 0x330   :  { %v1816_v53 = vpop.eup %1815  ;;  %v1250_v5 = vadd.f32 1.0, %v1814_v49  ;;  %1835 = vtanh.f32 %v1197_v43  ;;  %v1199_v17 = vmul.f32 0.5, %v1047_v47  ;;  %v1160_v52 = vadd.f32 %v1159_v62, %v922_v27  ;;  %v1050_v55 = vpop.f32.mrb[40].mxu0 }
 0x331   :  { %v1818_v56 = vpop.eup %1817  ;;  %1837 = vtanh.f32 %v1198_v51  ;;  %v1200_v57 = vmul.f32 0.5, %v1158_v50  ;;  %v1051_v60 = vadd.f32 %v1050_v55, %v927_v4  ;;  %v1052_v61 = vpop.f32.mrb[41].mxu0  ;;  %v1251_v6 = vadd.f32 1.0, %v1816_v53 }
 0x332   :  { %v1820_v2 = vpop.eup %1819  ;;  %1839 = vtanh.f32 %v1199_v17  ;;  %v1201_v63 = vmul.f32 0.5, %v1160_v52  ;;  %v1163_v1 = vpop.f32.mrb[40].mxu1  ;;  %v2211_v3 = vmul.f32 0.5, %v1250_v5  ;;  %v1252_v7 = vadd.f32 1.0, %v1818_v56 }
 0x333   :  { %v1822_v58 = vpop.eup %1821  ;;  %1841 = vtanh.f32 %v1200_v57  ;;  %v1202_v8 = vmul.f32 0.5, %v1051_v60  ;;  %v1165_v11 = vpop.f32.mrb[41].mxu1  ;;  %v1164_v15 = vadd.f32 %v1163_v1, %v927_v4  ;;  %v1253_v24 = vadd.f32 1.0, %v1820_v2 }
 0x334   :  { %v1824_v12 = vpop.eup %1823  ;;  %v1254_v13 = vadd.f32 1.0, %v1822_v58  ;;  %1843 = vtanh.f32 %v1201_v63  ;;  %v1056_v20 = vpop.f32.mrb[42].mxu0  ;;  %v1053_v54 = vadd.f32 %v1052_v61, %v927_v4  ;;  %v1166_v9 = vadd.f32 %v1165_v11, %v927_v4 }
 0x335   :  { %v1826_v29 = vpop.eup %1825  ;;  %v1255_v48 = vadd.f32 1.0, %v1824_v12  ;;  %1845 = vtanh.f32 %v1202_v8  ;;  %v1058_v32 = vpop.f32.mrb[43].mxu0  ;;  %v1204_v0 = vmul.f32 0.5, %v1164_v15  ;;  %v1057_v39 = vadd.f32 %v1056_v20, %v932_v10 }
 0x336   :  { %v1828_v28 = vpop.eup %1827  ;;  %v2213_v59 = vmul.f32 0.5, %v1254_v13  ;;  %v1256_v33 = vadd.f32 1.0, %v1826_v29  ;;  %v1169_v34 = vpop.f32.mrb[42].mxu1  ;;  %v1203_v37 = vmul.f32 0.5, %v1053_v54  ;;  %v2215_v42 = vmul.f32 0.5, %v1252_v7 }
 0x337   :  { %v1830_v36 = vpop.eup %1829  ;;  %v1257_v38 = vadd.f32 1.0, %v1828_v28  ;;  %v1171_v40 = vpop.f32.mrb[43].mxu1  ;;  %v2221_v21 = vmul.f32 0.5, %v1251_v6  ;;  %1847 = vtanh.f32 %v1204_v0  ;;  %v1205_v23 = vmul.f32 0.5, %v1166_v9 }
 0x338   :  { %v1832_v41 = vpop.eup %1831  ;;  %v1644_v45 = vpack.c.bf16 %v2213_v59, %v2211_v3  ;;  %v2219_v14 = vmul.f32 0.5, %v1256_v33  ;;  %v1062_v18 = vpop.f32.mrb[44].mxu0  ;;  %v1258_v22 = vadd.f32 1.0, %v1830_v36  ;;  %v2223_v46 = vmul.f32 0.5, %v1253_v24 }
 0x339   :  { %v1834_v19 = vpop.eup %1833  ;;  %v1064_v25 = vpop.f32.mrb[45].mxu0  ;;  %v1287_v30 = vmul.f32 0.5, %v1255_v48  ;;  %v1206_v31 = vmul.f32 0.5, %v1057_v39  ;;  %v1289_v43 = vmul.f32 0.5, %v1257_v38  ;;  %1849 = vtanh.f32 %v1203_v37 }
 0x33a   :  { %v1836_v27 = vpop.eup %1835  ;;  %v1660_v16 = vpack.c.bf16 %v2219_v14, %v2215_v42  ;;  %v1175_v35 = vpop.f32.mrb[44].mxu1  ;;  %v1260_v44 = vadd.f32 1.0, %v1834_v19  ;;  %v1170_v47 = vadd.f32 %v1169_v34, %v932_v10  ;;  %v1259_v50 = vadd.f32 1.0, %v1832_v41 }
 0x33b   :  { %v1838_v26 = vpop.eup %1837  ;;  %v1177_v49 = vpop.f32.mrb[45].mxu1  ;;  %1851 = vtanh.f32 %v1206_v31  ;;  %v1059_v53 = vadd.f32 %v1058_v32, %v932_v10  ;;  %v2227_v52 = vmul.f32 0.5, %v1258_v22  ;;  %v1172_v56 = vadd.f32 %v1171_v40, %v932_v10 }
 0x33c   :  { %v1840_v51 = vpop.eup %1839  ;;  %v1262_v62 = vadd.f32 1.0, %v1838_v26  ;;  %v1068_v4 = vpop.f32.mrb[46].mxu0  ;;  %1853 = vtanh.f32 %v1205_v23  ;;  %v1208_v55 = vmul.f32 0.5, %v1170_v47  ;;  %v2231_v8 = vmul.f32 0.5, %v1260_v44 }
 0x33d   :  { %v1842_v5 = vpop.eup %1841  ;;  %v937_v17 = vpop.permute.xlu1 %936  ;;  %v1207_v63 = vmul.f32 0.5, %v1059_v53  ;;  %v1261_v11 = vadd.f32 1.0, %v1836_v27  ;;  %v1209_v12 = vmul.f32 0.5, %v1172_v56  ;;  %v1263_v20 = vadd.f32 1.0, %v1840_v51 }
 0x33e   :  { %v1070_v57 = vpop.f32.mrb[47].mxu0  ;;  %v1844_v60 = vpop.eup %1843  ;;  %v2229_v61 = vmul.f32 0.5, %v1262_v62  ;;  %v1264_v2 = vadd.f32 1.0, %v1842_v5  ;;  %v1063_v1 = vadd.f32 %v1062_v18, %v937_v17  ;;  %1855 = vtanh.f32 %v1208_v55 }
 0x33f   :  { %v1181_v58 = vpop.f32.mrb[46].mxu1  ;;  %v1846_v6 = vpop.eup %1845  ;;  %1857 = vtanh.f32 %v1207_v63  ;;  %v1265_v29 = vadd.f32 1.0, %v1844_v60  ;;  %v1176_v48 = vadd.f32 %v1175_v35, %v937_v17  ;;  %v1065_v28 = vadd.f32 %v1064_v25, %v937_v17 }
 0x340   :  { %v1183_v7 = vpop.f32.mrb[47].mxu1  ;;  %v1648_v13 = vpack.c.bf16 %v2229_v61, %v2227_v52  ;;  %v2235_v15 = vmul.f32 0.5, %v1264_v2  ;;  %1859 = vtanh.f32 %v1209_v12  ;;  %v1210_v24 = vmul.f32 0.5, %v1063_v1  ;;  %v942_v38 = vpop.permute.xlu0 %941 }
 0x341   :  { %v1266_v32 = vadd.f32 1.0, %v1846_v6  ;;  %v1178_v10 = vadd.f32 %v1177_v49, %v937_v17  ;;  %v1848_v33 = vpop.eup %1847  ;;  %v1291_v0 = vmul.f32 0.5, %v1259_v50  ;;  %v1293_v9 = vmul.f32 0.5, %v1261_v11 }
 0x342   :  { %v1664_v54 = vpack.c.bf16 %v2235_v15, %v2231_v8  ;;  %v1212_v34 = vmul.f32 0.5, %v1176_v48  ;;  %v1642_v36 = vpack.c.bf16 %v1287_v30, %v2221_v21  ;;  %v1295_v37 = vmul.f32 0.5, %v1263_v20 }
 0x343   :  { %v1211_v39 = vmul.f32 0.5, %v1065_v28  ;;  %v1213_v40 = vmul.f32 0.5, %v1178_v10  ;;  %v1658_v41 = vpack.c.bf16 %v1289_v43, %v2223_v46  ;;  %v1850_v18 = vpop.eup %1849  ;;  %v1297_v19 = vmul.f32 0.5, %v1265_v29 }
 0x344   :  { %1861 = vtanh.f32 %v1210_v24  ;;  %1643 = vmatprep.subr.bf16.mxu0 %v1642_v36  ;;  %v1069_v22 = vadd.f32 %v1068_v4, %v942_v38  ;;  %v1182_v23 = vadd.f32 %v1181_v58, %v942_v38  ;;  %v1298_v27 = vmul.f32 0.5, %v1266_v32 }
 0x345   :  { %v1852_v25 = vpop.eup %1851  ;;  %v1268_v31 = vadd.f32 1.0, %v1848_v33  ;;  %1863 = vtanh.f32 %v1212_v34  ;;  %1659 = vmatprep.subr.bf16.mxu1 %v1658_v41  ;;  %1645 = vmatpush1.bf16.msra.mxu0 %v1644_v45  ;;  %v1071_v21 = vadd.f32 %v1070_v57, %v942_v38  ;;  %v1184_v44 = vadd.f32 %v1183_v7, %v942_v38 }
 0x346   :  { %v1854_v30 = vpop.eup %1853  ;;  %v1270_v35 = vadd.f32 1.0, %v1852_v25  ;;  %1865 = vtanh.f32 %v1211_v39  ;;  %v1214_v46 = vmul.f32 0.5, %v1069_v22  ;;  %v1216_v26 = vmul.f32 0.5, %v1182_v23  ;;  %1661 = vmatpush1.bf16.msra.mxu1 %v1660_v16 }
 0x347   :  { %1867 = vtanh.f32 %v1213_v40  ;;  %v1215_v43 = vmul.f32 0.5, %v1071_v21  ;;  %v1646_v47 = vpack.c.bf16 %v1295_v37, %v1291_v0  ;;  %v1267_v51 = vadd.f32 1.0, %v1850_v18  ;;  %v1901_v18 = vld [vmem:[#allocation4 + $0xc0] sm:$0xff] }
 0x348   :  { %v1856_v49 = vpop.eup %1855  ;;  %v1302_v50 = vmul.f32 0.5, %v1270_v35  ;;  %1869 = vtanh.f32 %v1214_v46  ;;  %v1662_v3 = vpack.c.bf16 %v1297_v19, %v1293_v9  ;;  %v1269_v45 = vadd.f32 1.0, %v1854_v30  ;;  %v1318_v19 = vpop.permute.xlu1 %1317 }
 0x349   :  { %v1858_v59 = vpop.eup %1857  ;;  %v1272_v62 = vadd.f32 1.0, %v1856_v49  ;;  %1871 = vtanh.f32 %v1216_v26  ;;  %v1217_v53 = vmul.f32 0.5, %v1184_v44  ;;  %1647 = vmatprep.subr.bf16.mxu0 %v1646_v47  ;;  %v1300_v42 = vmul.f32 0.5, %v1268_v31 }
 0x34a   :  { %v1860_v4 = vpop.eup %1859  ;;  %v1652_v5 = vpack.c.bf16 %v1302_v50, %v1298_v27  ;;  %v1271_v17 = vadd.f32 1.0, %v1858_v59  ;;  %1873 = vtanh.f32 %v1215_v43  ;;  %1663 = vmatprep.subr.bf16.mxu1 %v1662_v3  ;;  %1649 = vmatpush1.bf16.msra.mxu0 %v1648_v13  ;;  %v1299_v52 = vmul.f32 0.5, %v1267_v51 }
 0x34b   :  { %v1304_v14 = vmul.f32 0.5, %v1272_v62  ;;  %v1273_v16 = vadd.f32 1.0, %v1860_v4  ;;  %1875 = vtanh.f32 %v1217_v53  ;;  %1665 = vmatpush1.bf16.msra.mxu1 %v1664_v54  ;;  %v1301_v56 = vmul.f32 0.5, %v1269_v45 }
 0x34c   :  { %v1303_v55 = vmul.f32 0.5, %v1271_v17 }
 0x34d   :  { %v1668_v57 = vpack.c.bf16 %v1304_v14, %v1300_v42  ;;  %v1305_v60 = vmul.f32 0.5, %v1273_v16 }
 0x34e   :  { %v1862_v61 = vpop.eup %1861  ;;  %v1650_v2 = vpack.c.bf16 %v1303_v55, %v1299_v52 }
 0x34f   :  { %v1864_v63 = vpop.eup %1863  ;;  %v1666_v1 = vpack.c.bf16 %v1305_v60, %v1301_v56  ;;  %v1274_v8 = vadd.f32 1.0, %v1862_v61 }
 0x350   :  { %v1866_v58 = vpop.eup %1865  ;;  %1651 = vmatprep.subr.bf16.mxu0 %v1650_v2  ;;  %v1276_v12 = vadd.f32 1.0, %v1864_v63  ;;  %v1903_v63 = vld [vmem:[#allocation2 + $0x10] sm:$0xff] }
 0x351   :  { %v1868_v6 = vpop.eup %1867  ;;  %1667 = vmatprep.subr.bf16.mxu1 %v1666_v1  ;;  %1653 = vmatpush1.bf16.msra.mxu0 %v1652_v5  ;;  %v1275_v13 = vadd.f32 1.0, %v1866_v58  ;;  %v1306_v54 = vmul.f32 0.5, %v1274_v8 }
 0x352   :  { %v1870_v11 = vpop.eup %1869  ;;  %1669 = vmatpush1.bf16.msra.mxu1 %v1668_v57  ;;  %v1277_v29 = vadd.f32 1.0, %v1868_v6  ;;  %v1308_v10 = vmul.f32 0.5, %v1276_v12  ;;  %v1902_v57 = vld [vmem:[#allocation2] sm:$0xff] }
 0x353   :  { %v1872_v7 = vpop.eup %1871  ;;  %v1278_v15 = vadd.f32 1.0, %v1870_v11  ;;  %v1307_v9 = vmul.f32 0.5, %v1275_v13  ;;  %v1904_v11 = vld [vmem:[#allocation2 + $0x8] sm:$0xff] }
 0x354   :  { %v1874_v20 = vpop.eup %1873  ;;  %v1280_v24 = vadd.f32 1.0, %v1872_v7  ;;  %v1309_v38 = vmul.f32 0.5, %v1277_v29 }
 0x355   :  { %v1876_v48 = vpop.eup %1875  ;;  %v1310_v32 = vmul.f32 0.5, %v1278_v15  ;;  %v1279_v28 = vadd.f32 1.0, %v1874_v20  ;;  %v1905_v15 = vld [vmem:[#allocation2 + $0x18] sm:$0xff] }
 0x356   :  { %v1312_v33 = vmul.f32 0.5, %v1280_v24  ;;  %v1281_v0 = vadd.f32 1.0, %v1876_v48 }
 0x357   :  { %v1656_v34 = vpack.c.bf16 %v1310_v32, %v1306_v54  ;;  %v1311_v36 = vmul.f32 0.5, %v1279_v28 }
 0x358   :  { %v1672_v37 = vpack.c.bf16 %v1312_v33, %v1308_v10  ;;  %v1313_v39 = vmul.f32 0.5, %v1281_v0 }
 0x359   :  { %v1654_v40 = vpack.c.bf16 %v1311_v36, %v1307_v9 }
 0x35a   :  { %v1670_v41 = vpack.c.bf16 %v1313_v39, %v1309_v38 }
 0x35b   :  { %1655 = vmatprep.subr.bf16.mxu0 %v1654_v40 }
 0x35c   :  { %1671 = vmatprep.subr.bf16.mxu1 %v1670_v41  ;;  %1657 = vmatpush1.bf16.msra.mxu0 %v1656_v34 }
 0x35d   :  { %1673 = vmatpush1.bf16.msra.mxu1 %v1672_v37 }
 0x35f   :  { %1576 = vmatmul.mubr.msk.f32.vlgmr.msra.gmra.mrb[48].mxu0 %vm525_vm2, %v1901_v18 }
 0x360   :  { %1577 = vmatmul.mubr.msk.f32.vlgmr.msra.gmra.mrb[48].mxu1 %vm525_vm2, %v1901_v18 }
 0x432   :  { %v1388_v22 = vpop.f32.mrb[48].mxu0 }
 0x433   :  { %v1389_v23 = vadd.f32 %v1388_v22, %v1318_v19  ;;  %v1459_v25 = vpop.f32.mrb[48].mxu1  ;;  %v1390_v27 = vpop.f32.mrb[49].mxu0 }
 0x434   :  { %v1460_v31 = vadd.f32 %v1459_v25, %v1318_v19  ;;  %v1391_v21 = vadd.f32 %v1390_v27, %v1318_v19  ;;  %v1461_v30 = vpop.f32.mrb[49].mxu1 }
 0x435   :  { %v1464_v35 = vmul.f32 0.5, %v1389_v23  ;;  %v1462_v46 = vadd.f32 %v1461_v30, %v1318_v19 }
 0x436   :  { %v1466_v26 = vmul.f32 0.5, %v1460_v31  ;;  %v1465_v43 = vmul.f32 0.5, %v1391_v21 }
 0x437   :  { %1877 = vtanh.f32 %v1464_v35  ;;  %v1467_v44 = vmul.f32 0.5, %v1462_v46 }
 0x438   :  { %1879 = vtanh.f32 %v1466_v26 }
 0x439   :  { %1881 = vtanh.f32 %v1465_v43 }
 0x43a   :  { %1883 = vtanh.f32 %v1467_v44 }
 0x441   :  { %v1878_v47 = vpop.eup %1877 }
 0x442   :  { %v1880_v49 = vpop.eup %1879  ;;  %v1472_v51 = vadd.f32 1.0, %v1878_v47 }
 0x443   :  { %v1882_v50 = vpop.eup %1881  ;;  %v1474_v3 = vadd.f32 1.0, %v1880_v49 }
 0x444   :  { %v1884_v59 = vpop.eup %1883  ;;  %v1476_v45 = vmul.f32 0.5, %v1472_v51  ;;  %v1473_v62 = vadd.f32 1.0, %v1882_v50 }
 0x445   :  { %v1478_v53 = vmul.f32 0.5, %v1474_v3  ;;  %v1475_v4 = vadd.f32 1.0, %v1884_v59 }
 0x446   :  { %v1480_v5 = vmul.f32 1.442695, %v1476_v45  ;;  %v1477_v17 = vmul.f32 0.5, %v1473_v62  ;;  %v1496_v61 = vrot.slane %v1476_v45, 4 }
 0x447   :  { %v1484_v42 = vmul.f32 1.442695, %v1478_v53  ;;  %v1479_v14 = vmul.f32 0.5, %v1475_v4  ;;  %v1498_v58 = vrot.slane %v1478_v53, 4 }
 0x448   :  { %1885 = vpow2.f32 %v1480_v5  ;;  %v1482_v16 = vmul.f32 1.442695, %v1477_v17  ;;  %v1497_v7 = vrot.slane %v1477_v17, 4 }
 0x449   :  { %1887 = vpow2.f32 %v1484_v42  ;;  %v1486_v52 = vmul.f32 1.442695, %v1479_v14  ;;  %v1499_v29 = vrot.slane %v1479_v14, 4 }
 0x44a   :  { %1889 = vpow2.f32 %v1482_v16 }
 0x44b   :  { %1891 = vpow2.f32 %v1486_v52 }
 0x452   :  { %v1886_v55 = vpop.eup %1885 }
 0x453   :  { %v1888_v56 = vpop.eup %1887  ;;  %v1488_v60 = vmul.f32 %v1902_v57, %v1886_v55 }
 0x454   :  { %v1890_v2 = vpop.eup %1889  ;;  %v1490_v1 = vmul.f32 %v1903_v63, %v1888_v56 }
 0x455   :  { %v1892_v6 = vpop.eup %1891  ;;  %v1504_v8 = vadd.f32 %v1496_v61, %v1488_v60  ;;  %v1489_v12 = vmul.f32 %v1904_v11, %v1890_v2 }
 0x456   :  { %v1506_v13 = vadd.f32 %v1498_v58, %v1490_v1  ;;  %v1491_v20 = vmul.f32 %v1905_v15, %v1892_v6 }
 0x457   :  { %v1505_v24 = vadd.f32 %v1497_v7, %v1489_v12 }
 0x458   :  { %v1507_v48 = vadd.f32 %v1499_v29, %v1491_v20 }
 0x459   :  { %v1512_v54 = vcombine.low %v1504_v8, %v1505_v24 }
 0x45a   :  { %v1513_v32 = vcombine.low %v1506_v13, %v1507_v48 }
 0x45b   :  { %1516 = vst [vmem:[%s2257_s2] sm:$0xff] %v1512_v54 }
 0x45c   :  { %1517 = vst [vmem:[%s2257_s2 + $0x8] sm:$0xff] %v1513_v32 }
 0x45d   :  { %1522 = vsyncpa [#allocation3], 1 }
 0x45e   :  { %1523 = vsyncpa [#allocation5], 1 }

</bundles_post_ra>
